<compile_context>
chip_gen: v5e
topology: v5e:2x2
jax: 0.10.0
libtpu: 0.0.40
codegen_flags: <defaults>
</compile_context>

<pallas_src>
import functools

import jax
import jax.numpy as jnp
from jax.experimental import pallas as pl
from jax.experimental.pallas import tpu as pltpu

# ---- static config (small shapes consistent with the module's forward) ----
B = 2
C_IN = 4
H = W = 16
KH = KW = 3
KCOL = KH * KW * C_IN       # 36
ROWS = B * H * W            # 512 (batch-major im2col rows)
C_FEAT = 32                 # backbone feature width == self.fc.in_features
NUM_CLASSES = 10            # self.fc out_features
NUM_CLASSES_PAD = 128       # lane-dense padded fc output width
DEC_OUT = 4096              # decoder Linear out_features (fixed by the module)
BN_EPS = 1e-5


# -------------------- Pallas kernels --------------------

def _fused_train_kernel(cols_ref, pool_ref, wc_ref, bc_ref,
                        wf_ref, bf_ref, g_ref, bt_ref, wd_ref, bd_ref,
                        x1_ref, x2_ref):
    """conv3x3(im2col)+bias+ReLU+GAP, then fc head and BN(train)+decoder."""
    # backbone: (B*H*W, KCOL) x (KCOL, C_FEAT) on the MXU
    y = jnp.dot(cols_ref[...], wc_ref[...], preferred_element_type=jnp.float32)
    y = jnp.maximum(y + bc_ref[...], 0.0)                       # (ROWS, C_FEAT)
    # global-average-pool as an MXU matmul (pool is block-diagonal 1/(H*W))
    feat = jnp.dot(pool_ref[...], y, preferred_element_type=jnp.float32)  # (B, C_FEAT)

    # fc head (padded to 128 lanes -> unmasked stores)
    x1_ref[...] = (jnp.dot(feat, wf_ref[...],
                           preferred_element_type=jnp.float32) + bf_ref[...])

    # BatchNorm1d, training mode: batch mean, biased batch variance
    mean = jnp.mean(feat, axis=0, keepdims=True)
    var = jnp.mean((feat - mean) ** 2, axis=0, keepdims=True)
    xn = (feat - mean) * jax.lax.rsqrt(var + BN_EPS) * g_ref[...] + bt_ref[...]

    # decoder Linear -> 4096
    x2_ref[...] = (jnp.dot(xn, wd_ref[...],
                           preferred_element_type=jnp.float32) + bd_ref[...])


def _fused_eval_kernel(cols_ref, pool_ref, wc_ref, bc_ref, wf_ref, bf_ref,
                       x1_ref):
    """Eval mode: backbone + fc only (decoder is never computed / DMA'd)."""
    y = jnp.dot(cols_ref[...], wc_ref[...], preferred_element_type=jnp.float32)
    y = jnp.maximum(y + bc_ref[...], 0.0)
    feat = jnp.dot(pool_ref[...], y, preferred_element_type=jnp.float32)
    x1_ref[...] = (jnp.dot(feat, wf_ref[...],
                           preferred_element_type=jnp.float32) + bf_ref[...])


# -------------------- wrapper --------------------

def _im2col(x_nchw):
    """NCHW -> zero-padded 3x3 patches, batch-major rows (B*H*W, KH*KW*C_IN)."""
    x = jnp.transpose(x_nchw, (0, 2, 3, 1)).astype(jnp.float32)   # (B,H,W,C_IN)
    xp = jnp.pad(x, ((0, 0), (1, 1), (1, 1), (0, 0)))
    cols = jnp.concatenate(
        [xp[:, kh:kh + H, kw:kw + W, :] for kh in range(KH) for kw in range(KW)],
        axis=-1)
    return cols.reshape(ROWS, KCOL)


def _pool_matrix():
    """(B, B*H*W) block-diagonal averaging matrix: GAP as an MXU matmul."""
    row_batch = jnp.arange(ROWS, dtype=jnp.int32)[None, :] // (H * W)
    batch_id = jnp.arange(B, dtype=jnp.int32)[:, None]
    return (row_batch == batch_id).astype(jnp.float32) / float(H * W)


_FULL = lambda i: (0, 0)   # single grid step: every block is the whole array


@functools.partial(jax.jit, static_argnames=("training",))
def dual_model_simple_forward(x_nchw, params, training=True):
    cols = _im2col(x_nchw)
    pool = _pool_matrix()
    w_col = params["w_conv"].reshape(KCOL, C_FEAT)
    b_col = params["b_conv"].reshape(1, C_FEAT)

    # lane-dense padded fc weights / bias
    w_fc_pad = jnp.zeros((C_FEAT, NUM_CLASSES_PAD), jnp.float32)
    w_fc_pad = w_fc_pad.at[:, :NUM_CLASSES].set(params["w_fc"])
    b_fc_pad = jnp.zeros((1, NUM_CLASSES_PAD), jnp.float32)
    b_fc_pad = b_fc_pad.at[:, :NUM_CLASSES].set(params["b_fc"])

    cparams = pltpu.CompilerParams(dimension_semantics=("arbitrary",))

    if training:
        x1_pad, x2 = pl.pallas_call(
            _fused_train_kernel,
            out_shape=(jax.ShapeDtypeStruct((B, NUM_CLASSES_PAD), jnp.float32),
                       jax.ShapeDtypeStruct((B, DEC_OUT), jnp.float32)),
            grid=(1,),
            in_specs=[
                pl.BlockSpec((ROWS, KCOL), _FULL),
                pl.BlockSpec((B, ROWS), _FULL),
                pl.BlockSpec((KCOL, C_FEAT), _FULL),
                pl.BlockSpec((1, C_FEAT), _FULL),
                pl.BlockSpec((C_FEAT, NUM_CLASSES_PAD), _FULL),
                pl.BlockSpec((1, NUM_CLASSES_PAD), _FULL),
                pl.BlockSpec((1, C_FEAT), _FULL),
                pl.BlockSpec((1, C_FEAT), _FULL),
                pl.BlockSpec((C_FEAT, DEC_OUT), _FULL),
                pl.BlockSpec((1, DEC_OUT), _FULL),
            ],
            out_specs=(pl.BlockSpec((B, NUM_CLASSES_PAD), _FULL),
                       pl.BlockSpec((B, DEC_OUT), _FULL)),
            compiler_params=cparams,
        )(cols, pool, w_col, b_col, w_fc_pad, b_fc_pad,
          params["bn_gamma"].reshape(1, C_FEAT),
          params["bn_beta"].reshape(1, C_FEAT),
          params["w_dec"], params["b_dec"].reshape(1, DEC_OUT))
        return x1_pad[:, :NUM_CLASSES], x2

    # eval: decoder path skipped entirely (no w_dec DMA, no 4096-wide matmul)
    x1_pad = pl.pallas_call(
        _fused_eval_kernel,
        out_shape=jax.ShapeDtypeStruct((B, NUM_CLASSES_PAD), jnp.float32),
        grid=(1,),
        in_specs=[
            pl.BlockSpec((ROWS, KCOL), _FULL),
            pl.BlockSpec((B, ROWS), _FULL),
            pl.BlockSpec((KCOL, C_FEAT), _FULL),
            pl.BlockSpec((1, C_FEAT), _FULL),
            pl.BlockSpec((C_FEAT, NUM_CLASSES_PAD), _FULL),
            pl.BlockSpec((1, NUM_CLASSES_PAD), _FULL),
        ],
        out_specs=pl.BlockSpec((B, NUM_CLASSES_PAD), _FULL),
        compiler_params=cparams,
    )(cols, pool, w_col, b_col, w_fc_pad, b_fc_pad)
    return x1_pad[:, :NUM_CLASSES]


# -------------------- deterministic params & pure-JAX reference --------------------

def init_params(key):
    ks = jax.random.split(key, 4)
    return {
        "w_conv": 0.1 * jax.random.normal(ks[0], (KH, KW, C_IN, C_FEAT), jnp.float32),
        "b_conv": 0.01 * jax.random.normal(ks[1], (C_FEAT,), jnp.float32),
        # stored as (in, out), i.e. transposed relative to torch Linear.weight
        "w_fc": 0.1 * jax.random.normal(ks[2], (C_FEAT, NUM_CLASSES), jnp.float32),
        "b_fc": jnp.zeros((NUM_CLASSES,), jnp.float32),
        "bn_gamma": jnp.ones((C_FEAT,), jnp.float32),
        "bn_beta": jnp.zeros((C_FEAT,), jnp.float32),
        "w_dec": 0.05 * jax.random.normal(ks[3], (C_FEAT, DEC_OUT), jnp.float32),
        "b_dec": jnp.zeros((DEC_OUT,), jnp.float32),
    }


def reference_forward(x_nchw, params, training=True):
    x = jnp.transpose(x_nchw, (0, 2, 3, 1)).astype(jnp.float32)
    y = jax.lax.conv_general_dilated(
        x, params["w_conv"], window_strides=(1, 1), padding="SAME",
        dimension_numbers=("NHWC", "HWIO", "NHWC"))
    y = jnp.maximum(y + params["b_conv"], 0.0)
    feat = jnp.mean(y, axis=(1, 2))
    x1 = feat @ params["w_fc"] + params["b_fc"]
    if not training:
        return x1
    mean = jnp.mean(feat, axis=0, keepdims=True)
    var = jnp.mean((feat - mean) ** 2, axis=0, keepdims=True)
    xn = (feat - mean) / jnp.sqrt(var + BN_EPS) * params["bn_gamma"] + params["bn_beta"]
    x2 = xn @ params["w_dec"] + params["b_dec"]
    return x1, x2


# TODO(synk): MetaBalance (self.metabalance.step) is a training-time gradient
# balancing optimizer, not part of the forward pass; intentionally not ported.

if __name__ == "__main__":
    params = init_params(jax.random.PRNGKey(42))
    x = jax.random.normal(jax.random.PRNGKey(0), (B, C_IN, H, W), jnp.float32)

    # training-mode forward: returns (x1, x2)
    x1, x2 = jax.block_until_ready(dual_model_simple_forward(x, params, training=True))
    r1, r2 = reference_forward(x, params, training=True)
    assert x1.shape == (B, NUM_CLASSES) and x2.shape == (B, DEC_OUT)
    assert jnp.allclose(x1, r1, rtol=1e-4, atol=1e-4)
    assert jnp.allclose(x2, r2, rtol=1e-4, atol=1e-4)

    # eval-mode forward: returns x1 only (decoder never executed)
    x1_eval = jax.block_until_ready(dual_model_simple_forward(x, params, training=False))
    r1_eval = reference_forward(x, params, training=False)
    assert x1_eval.shape == (B, NUM_CLASSES)
    assert jnp.allclose(x1_eval, r1_eval, rtol=1e-4, atol=1e-4)

    print("KERNEL_OK")
</pallas_src>

<mosaic_0001>
module attributes {stable_mosaic.version = 11 : i64} {
  func.func @_fused_train_kernel(%arg0: i32, %arg1: memref<512x36xf32, #tpu.memory_space<vmem>>, %arg2: memref<2x512xf32, #tpu.memory_space<vmem>>, %arg3: memref<36x32xf32, #tpu.memory_space<vmem>>, %arg4: memref<1x32xf32, #tpu.memory_space<vmem>>, %arg5: memref<32x128xf32, #tpu.memory_space<vmem>>, %arg6: memref<1x128xf32, #tpu.memory_space<vmem>>, %arg7: memref<1x32xf32, #tpu.memory_space<vmem>>, %arg8: memref<1x32xf32, #tpu.memory_space<vmem>>, %arg9: memref<32x4096xf32, #tpu.memory_space<vmem>>, %arg10: memref<1x4096xf32, #tpu.memory_space<vmem>>, %arg11: memref<2x128xf32, #tpu.memory_space<vmem>>, %arg12: memref<2x4096xf32, #tpu.memory_space<vmem>>) attributes {dimension_semantics = [#tpu.dimension_semantics<arbitrary>], iteration_bounds = array<i64: 1>, scalar_prefetch = 0 : i64, scratch_operands = 0 : i64, tpu.core_type = #tpu.core_type<tc>, window_params = [{pipeline_mode = #tpu.pipeline_mode<synchronous>, transform_indices = @transform_0, window_bounds = array<i64: 512, 36>}, {pipeline_mode = #tpu.pipeline_mode<synchronous>, transform_indices = @transform_1, window_bounds = array<i64: 2, 512>}, {pipeline_mode = #tpu.pipeline_mode<synchronous>, transform_indices = @transform_2, window_bounds = array<i64: 36, 32>}, {pipeline_mode = #tpu.pipeline_mode<synchronous>, transform_indices = @transform_3, window_bounds = array<i64: 1, 32>}, {pipeline_mode = #tpu.pipeline_mode<synchronous>, transform_indices = @transform_4, window_bounds = array<i64: 32, 128>}, {pipeline_mode = #tpu.pipeline_mode<synchronous>, transform_indices = @transform_5, window_bounds = array<i64: 1, 128>}, {pipeline_mode = #tpu.pipeline_mode<synchronous>, transform_indices = @transform_6, window_bounds = array<i64: 1, 32>}, {pipeline_mode = #tpu.pipeline_mode<synchronous>, transform_indices = @transform_7, window_bounds = array<i64: 1, 32>}, {pipeline_mode = #tpu.pipeline_mode<synchronous>, transform_indices = @transform_8, window_bounds = array<i64: 32, 4096>}, {pipeline_mode = #tpu.pipeline_mode<synchronous>, transform_indices = @transform_9, window_bounds = array<i64: 1, 4096>}, {pipeline_mode = #tpu.pipeline_mode<synchronous>, transform_indices = @transform_10, window_bounds = array<i64: 2, 128>}, {pipeline_mode = #tpu.pipeline_mode<synchronous>, transform_indices = @transform_11, window_bounds = array<i64: 2, 4096>}]} {
    %c0 = arith.constant 0 : index
    %c0_0 = arith.constant 0 : index
    %0 = vector.load %arg1[%c0, %c0_0] : memref<512x36xf32, #tpu.memory_space<vmem>>, vector<512x36xf32>
    %c0_1 = arith.constant 0 : index
    %c0_2 = arith.constant 0 : index
    %1 = vector.load %arg3[%c0_1, %c0_2] : memref<36x32xf32, #tpu.memory_space<vmem>>, vector<36x32xf32>
    %cst = arith.constant dense<0.000000e+00> : vector<512x32xf32>
    %2 = tpu.matmul %0, %1, %cst {dimension_numbers = #tpu.dot_dimension_numbers<[1], [0], [0], [1], [0, 0, 1, 1], [], []>} : vector<512x36xf32>, vector<36x32xf32>, vector<512x32xf32> -> vector<512x32xf32>
    %c0_3 = arith.constant 0 : index
    %c0_4 = arith.constant 0 : index
    %3 = vector.load %arg4[%c0_3, %c0_4] : memref<1x32xf32, #tpu.memory_space<vmem>>, vector<1x32xf32>
    %4 = vector.broadcast %3 : vector<1x32xf32> to vector<512x32xf32>
    %5 = arith.addf %2, %4 : vector<512x32xf32>
    %cst_5 = arith.constant 0.000000e+00 : f32
    %6 = vector.broadcast %cst_5 : f32 to vector<512x32xf32>
    %7 = arith.maximumf %5, %6 : vector<512x32xf32>
    %c0_6 = arith.constant 0 : index
    %c0_7 = arith.constant 0 : index
    %8 = vector.load %arg2[%c0_6, %c0_7] : memref<2x512xf32, #tpu.memory_space<vmem>>, vector<2x512xf32>
    %cst_8 = arith.constant dense<0.000000e+00> : vector<2x32xf32>
    %9 = tpu.matmul %8, %7, %cst_8 {dimension_numbers = #tpu.dot_dimension_numbers<[1], [0], [0], [1], [0, 0, 1, 1], [], []>} : vector<2x512xf32>, vector<512x32xf32>, vector<2x32xf32> -> vector<2x32xf32>
    %c0_9 = arith.constant 0 : index
    %c0_10 = arith.constant 0 : index
    %10 = vector.load %arg5[%c0_9, %c0_10] : memref<32x128xf32, #tpu.memory_space<vmem>>, vector<32x128xf32>
    %cst_11 = arith.constant dense<0.000000e+00> : vector<2x128xf32>
    %11 = tpu.matmul %9, %10, %cst_11 {dimension_numbers = #tpu.dot_dimension_numbers<[1], [0], [0], [1], [0, 0, 1, 1], [], []>} : vector<2x32xf32>, vector<32x128xf32>, vector<2x128xf32> -> vector<2x128xf32>
    %c0_12 = arith.constant 0 : index
    %c0_13 = arith.constant 0 : index
    %12 = vector.load %arg6[%c0_12, %c0_13] : memref<1x128xf32, #tpu.memory_space<vmem>>, vector<1x128xf32>
    %13 = vector.broadcast %12 : vector<1x128xf32> to vector<2x128xf32>
    %14 = arith.addf %11, %13 : vector<2x128xf32>
    %c0_14 = arith.constant 0 : index
    %c0_15 = arith.constant 0 : index
    %15 = vector.load %arg11[%c0_14, %c0_15] : memref<2x128xf32, #tpu.memory_space<vmem>>, vector<2x128xf32>
    tpu.vector_store %arg11[%c0_14, %c0_15], %14 {strides = array<i32>} : memref<2x128xf32, #tpu.memory_space<vmem>>, vector<2x128xf32>,
    %cst_16 = arith.constant dense<0.000000e+00> : vector<32xf32>
    %16 = vector.multi_reduction <add>, %9, %cst_16 [0] : vector<2x32xf32> to vector<32xf32>
    %17 = vector.shape_cast %16 : vector<32xf32> to vector<1x32xf32>
    %cst_17 = arith.constant 2.000000e+00 : f32
    %18 = vector.broadcast %cst_17 : f32 to vector<1x32xf32>
    %19 = arith.divf %17, %18 : vector<1x32xf32>
    %20 = vector.broadcast %19 : vector<1x32xf32> to vector<2x32xf32>
    %21 = arith.subf %9, %20 : vector<2x32xf32>
    %22 = arith.mulf %21, %21 : vector<2x32xf32>
    %cst_18 = arith.constant dense<0.000000e+00> : vector<32xf32>
    %23 = vector.multi_reduction <add>, %22, %cst_18 [0] : vector<2x32xf32> to vector<32xf32>
    %24 = vector.shape_cast %23 : vector<32xf32> to vector<1x32xf32>
    %cst_19 = arith.constant 2.000000e+00 : f32
    %25 = vector.broadcast %cst_19 : f32 to vector<1x32xf32>
    %26 = arith.divf %24, %25 : vector<1x32xf32>
    %27 = vector.broadcast %19 : vector<1x32xf32> to vector<2x32xf32>
    %28 = arith.subf %9, %27 : vector<2x32xf32>
    %cst_20 = arith.constant 9.99999974E-6 : f32
    %29 = vector.broadcast %cst_20 : f32 to vector<1x32xf32>
    %30 = arith.addf %26, %29 : vector<1x32xf32>
    %31 = math.rsqrt %30 : vector<1x32xf32>
    %32 = vector.broadcast %31 : vector<1x32xf32> to vector<2x32xf32>
    %33 = arith.mulf %28, %32 : vector<2x32xf32>
    %c0_21 = arith.constant 0 : index
    %c0_22 = arith.constant 0 : index
    %34 = vector.load %arg7[%c0_21, %c0_22] : memref<1x32xf32, #tpu.memory_space<vmem>>, vector<1x32xf32>
    %35 = vector.broadcast %34 : vector<1x32xf32> to vector<2x32xf32>
    %36 = arith.mulf %33, %35 : vector<2x32xf32>
    %c0_23 = arith.constant 0 : index
    %c0_24 = arith.constant 0 : index
    %37 = vector.load %arg8[%c0_23, %c0_24] : memref<1x32xf32, #tpu.memory_space<vmem>>, vector<1x32xf32>
    %38 = vector.broadcast %37 : vector<1x32xf32> to vector<2x32xf32>
    %39 = arith.addf %36, %38 : vector<2x32xf32>
    %c0_25 = arith.constant 0 : index
    %c0_26 = arith.constant 0 : index
    %40 = vector.load %arg9[%c0_25, %c0_26] : memref<32x4096xf32, #tpu.memory_space<vmem>>, vector<32x4096xf32>
    %cst_27 = arith.constant dense<0.000000e+00> : vector<2x4096xf32>
    %41 = tpu.matmul %39, %40, %cst_27 {dimension_numbers = #tpu.dot_dimension_numbers<[1], [0], [0], [1], [0, 0, 1, 1], [], []>} : vector<2x32xf32>, vector<32x4096xf32>, vector<2x4096xf32> -> vector<2x4096xf32>
    %c0_28 = arith.constant 0 : index
    %c0_29 = arith.constant 0 : index
    %42 = vector.load %arg10[%c0_28, %c0_29] : memref<1x4096xf32, #tpu.memory_space<vmem>>, vector<1x4096xf32>
    %43 = vector.broadcast %42 : vector<1x4096xf32> to vector<2x4096xf32>
    %44 = arith.addf %41, %43 : vector<2x4096xf32>
    %c0_30 = arith.constant 0 : index
    %c0_31 = arith.constant 0 : index
    %45 = vector.load %arg12[%c0_30, %c0_31] : memref<2x4096xf32, #tpu.memory_space<vmem>>, vector<2x4096xf32>
    tpu.vector_store %arg12[%c0_30, %c0_31], %44 {strides = array<i32>} : memref<2x4096xf32, #tpu.memory_space<vmem>>, vector<2x4096xf32>,
    return
  }
  func.func @transform_0(%arg0: i32) -> (i32, i32) {
    %c0_i32 = arith.constant 0 : i32
    %c0_i32_0 = arith.constant 0 : i32
    %c0_i32_1 = arith.constant 0 : i32
    return %c0_i32, %c0_i32_0 : i32, i32
  }
  func.func @transform_1(%arg0: i32) -> (i32, i32) {
    %c0_i32 = arith.constant 0 : i32
    %c0_i32_0 = arith.constant 0 : i32
    %c0_i32_1 = arith.constant 0 : i32
    return %c0_i32, %c0_i32_0 : i32, i32
  }
  func.func @transform_2(%arg0: i32) -> (i32, i32) {
    %c0_i32 = arith.constant 0 : i32
    %c0_i32_0 = arith.constant 0 : i32
    %c0_i32_1 = arith.constant 0 : i32
    return %c0_i32, %c0_i32_0 : i32, i32
  }
  func.func @transform_3(%arg0: i32) -> (i32, i32) {
    %c0_i32 = arith.constant 0 : i32
    %c0_i32_0 = arith.constant 0 : i32
    %c0_i32_1 = arith.constant 0 : i32
    return %c0_i32, %c0_i32_0 : i32, i32
  }
  func.func @transform_4(%arg0: i32) -> (i32, i32) {
    %c0_i32 = arith.constant 0 : i32
    %c0_i32_0 = arith.constant 0 : i32
    %c0_i32_1 = arith.constant 0 : i32
    return %c0_i32, %c0_i32_0 : i32, i32
  }
  func.func @transform_5(%arg0: i32) -> (i32, i32) {
    %c0_i32 = arith.constant 0 : i32
    %c0_i32_0 = arith.constant 0 : i32
    %c0_i32_1 = arith.constant 0 : i32
    return %c0_i32, %c0_i32_0 : i32, i32
  }
  func.func @transform_6(%arg0: i32) -> (i32, i32) {
    %c0_i32 = arith.constant 0 : i32
    %c0_i32_0 = arith.constant 0 : i32
    %c0_i32_1 = arith.constant 0 : i32
    return %c0_i32, %c0_i32_0 : i32, i32
  }
  func.func @transform_7(%arg0: i32) -> (i32, i32) {
    %c0_i32 = arith.constant 0 : i32
    %c0_i32_0 = arith.constant 0 : i32
    %c0_i32_1 = arith.constant 0 : i32
    return %c0_i32, %c0_i32_0 : i32, i32
  }
  func.func @transform_8(%arg0: i32) -> (i32, i32) {
    %c0_i32 = arith.constant 0 : i32
    %c0_i32_0 = arith.constant 0 : i32
    %c0_i32_1 = arith.constant 0 : i32
    return %c0_i32, %c0_i32_0 : i32, i32
  }
  func.func @transform_9(%arg0: i32) -> (i32, i32) {
    %c0_i32 = arith.constant 0 : i32
    %c0_i32_0 = arith.constant 0 : i32
    %c0_i32_1 = arith.constant 0 : i32
    return %c0_i32, %c0_i32_0 : i32, i32
  }
  func.func @transform_10(%arg0: i32) -> (i32, i32) {
    %c0_i32 = arith.constant 0 : i32
    %c0_i32_0 = arith.constant 0 : i32
    %c0_i32_1 = arith.constant 0 : i32
    return %c0_i32, %c0_i32_0 : i32, i32
  }
  func.func @transform_11(%arg0: i32) -> (i32, i32) {
    %c0_i32 = arith.constant 0 : i32
    %c0_i32_0 = arith.constant 0 : i32
    %c0_i32_1 = arith.constant 0 : i32
    return %c0_i32, %c0_i32_0 : i32, i32
  }
}

</mosaic_0001>

<bundles_post_ra>
// kernel: dual_model_simple_forward.1
= control target key start
LH: loop header
LB: loop body
LE: loop exit
PB: predicated region body
PF: predicated region fallthrough
CT: control target
= control target key end

     0   :  { %17 = vsyncpa [#allocation3], 0  ;;  %vm305_vm0 = vcmask 1043456   ;;  %s2930_s0 = inlined_call_operand.vmem [shape: f32[512,36], index: 0, kind: input, shape index: {}]   ;;  %s2931_s1 = inlined_call_operand.vmem [shape: f32[2,512], index: 1, kind: input, shape index: {}]   ;;  %s2932_s2 = inlined_call_operand.vmem [shape: f32[36,32], index: 2, kind: input, shape index: {}]   ;;  %s2933_s3 = inlined_call_operand.vmem [shape: f32[1,32], index: 3, kind: input, shape index: {}]   ;;  %s2934_s4 = inlined_call_operand.vmem [shape: f32[32,128], index: 4, kind: input, shape index: {}]   ;;  %s2935_s5 = inlined_call_operand.vmem [shape: f32[1,128], index: 5, kind: input, shape index: {}]   ;;  %s2936_s6 = inlined_call_operand.vmem [shape: f32[1,32], index: 6, kind: input, shape index: {}]   ;;  %s2937_s7 = inlined_call_operand.vmem [shape: f32[1,32], index: 7, kind: input, shape index: {}]   ;;  %s2938_s8 = inlined_call_operand.vmem [shape: f32[32,4096], index: 8, kind: input, shape index: {}]   ;;  %s2939_s9 = inlined_call_operand.vmem [shape: f32[1,4096], index: 9, kind: input, shape index: {}]   ;;  %s2940_s10 = inlined_call_operand.hbm [shape: f32[2,128], index: 10, kind: output, shape index: {0}]   ;;  %s2941_s11 = inlined_call_operand.hbm [shape: f32[2,4096], index: 11, kind: output, shape index: {1}]  }
   0x1   :  { %v107_v0 = vld [vmem:[%s2932_s2 + $0x20] sm:$0xf]  ;;  %v106_v1 = vld [vmem:[%s2932_s2 + $0x18] sm:$0xff]  ;;  %v105_v2 = vld [vmem:[%s2932_s2 + $0x10] sm:$0xff] }
   0x2   :  { %1727 = vmatpush.msk.msra.mxu0 %vm305_vm0, %v107_v0  ;;  %1826 = vmatpush.msk.msra.mxu2 %vm305_vm0, %v107_v0  ;;  %v104_v3 = vld [vmem:[%s2932_s2 + $0x8] sm:$0xff] }
   0x3   :  { %1827 = vmatpush.msk.msra.mxu3 %vm305_vm0, %v107_v0  ;;  %1825 = vmatpush.msk.msra.mxu1 %vm305_vm0, %v107_v0 }
   0x4   :  { %321 = vmatpush.msra.mxu0 %v106_v1  ;;  %1829 = vmatpush.msra.mxu2 %v106_v1 }
   0x5   :  { %1830 = vmatpush.msra.mxu3 %v106_v1  ;;  %1828 = vmatpush.msra.mxu1 %v106_v1 }
   0x6   :  { %322 = vmatpush.msra.mxu0 %v105_v2  ;;  %1832 = vmatpush.msra.mxu2 %v105_v2 }
   0x7   :  { %18 = vsyncpa [#allocation5], 0  ;;  %v103_v4 = vld [vmem:[%s2932_s2] sm:$0xff]  ;;  %1833 = vmatpush.msra.mxu3 %v105_v2  ;;  %1831 = vmatpush.msra.mxu1 %v105_v2  ;;  %vm112_vm1 = vcmask 293888   ;;  %v76_v6 = vld [vmem:[%s2930_s0 + $0x128] sm:$0xff]  ;;  %vm706_vm2 = vcmask 254976  }
   0x8   :  { %323 = vmatpush.msra.mxu0 %v104_v3  ;;  %v39_v5 = vld [vmem:[%s2930_s0] sm:$0xff]  ;;  %1835 = vmatpush.msra.mxu2 %v104_v3  ;;  %v40_v7 = vld [vmem:[%s2930_s0 + $0x8] sm:$0xff]  ;;  %v77_v8 = vld [vmem:[%s2930_s0 + $0x130] sm:$0xff]  ;;  %vm681_vm3 = vcmask 261120   ;;  %s1904_s28 = smov [#allocation2]   ;;  %vm1653_vm8 = vcmask 1041408  }
   0x9   :  { %1836 = vmatpush.msra.mxu3 %v104_v3  ;;  %1834 = vmatpush.msra.mxu1 %v104_v3  ;;  %v41_v9 = vld [vmem:[%s2930_s0 + $0x10] sm:$0xff]  ;;  %v78_v10 = vld [vmem:[%s2930_s0 + $0x138] sm:$0xff]  ;;  %v79_v13 = vld [vmem:[%s2930_s0 + $0x140] sm:$0xff]  ;;  %s1700_s29 = sshll.u32 %s1904_s28, 4  ;;  %vm1655_vm9 = vcmask 1045508   ;;  %s1713_s17 = sshll.u32 %s2941_s11, 4  ;;  %s1701_s29 = int_to_ptr.vmem [resolvable:$true] %s1700_s29  ;;  %s1714_s17 = int_to_ptr.hbm [resolvable:$true] %s1713_s17 }
   0xa   :  { %324 = vmatpush.msra.mxu0 %v103_v4  ;;  %1838 = vmatpush.msra.mxu2 %v103_v4  ;;  %v90_v11 = vld [vmem:[%s2930_s0 + $0x198] sm:$0xff]  ;;  %v91_v14 = vld [vmem:[%s2930_s0 + $0x1a0] sm:$0xff]  ;;  %v80_v16 = vld [vmem:[%s2930_s0 + $0x148] sm:$0xff] }
   0xb   :  { %1728 = vmatmul.msk.f32.vlgmr.msra.gmra.mxu0 %vm112_vm1, %v39_v5  ;;  %1765 = vmatmul.msk.f32.vlgmr.msra.gmra.mxu2 %vm112_vm1, %v76_v6  ;;  %v42_v12 = vld [vmem:[%s2930_s0 + $0x18] sm:$0xff]  ;;  %v43_v15 = vld [vmem:[%s2930_s0 + $0x20] sm:$0xff]  ;;  %v92_v17 = vld [vmem:[%s2930_s0 + $0x1a8] sm:$0xff] }
   0xc   :  { %1839 = vmatpush.msra.mxu3 %v103_v4  ;;  %1837 = vmatpush.msra.mxu1 %v103_v4  ;;  %v44_v18 = vld [vmem:[%s2930_s0 + $0x28] sm:$0xff]  ;;  %v81_v19 = vld [vmem:[%s2930_s0 + $0x150] sm:$0xff]  ;;  %v82_v22 = vld [vmem:[%s2930_s0 + $0x158] sm:$0xff] }
   0xd   :  { %1779 = vmatmul.msk.f32.vlgmr.msra.gmra.mxu3 %vm112_vm1, %v90_v11  ;;  %v93_v20 = vld [vmem:[%s2930_s0 + $0x1b0] sm:$0xff]  ;;  %v94_v23 = vld [vmem:[%s2930_s0 + $0x1b8] sm:$0xff]  ;;  %v83_v25 = vld [vmem:[%s2930_s0 + $0x160] sm:$0xff] }
   0xe   :  { %v45_v21 = vld [vmem:[%s2930_s0 + $0x30] sm:$0xff]  ;;  %v46_v24 = vld [vmem:[%s2930_s0 + $0x38] sm:$0xff]  ;;  %v95_v26 = vld [vmem:[%s2930_s0 + $0x1c0] sm:$0xff] }
   0xf   :  { %v47_v27 = vld [vmem:[%s2930_s0 + $0x40] sm:$0xff]  ;;  %v84_v28 = vld [vmem:[%s2930_s0 + $0x168] sm:$0xff]  ;;  %v85_v31 = vld [vmem:[%s2930_s0 + $0x170] sm:$0xff] }
  0x10   :  { %v96_v29 = vld [vmem:[%s2930_s0 + $0x1c8] sm:$0xff]  ;;  %v97_v32 = vld [vmem:[%s2930_s0 + $0x1d0] sm:$0xff]  ;;  %v86_v34 = vld [vmem:[%s2930_s0 + $0x178] sm:$0xff] }
  0x11   :  { %v48_v30 = vld [vmem:[%s2930_s0 + $0x48] sm:$0xff]  ;;  %v49_v33 = vld [vmem:[%s2930_s0 + $0x50] sm:$0xff]  ;;  %v98_v35 = vld [vmem:[%s2930_s0 + $0x1d8] sm:$0xff] }
  0x12   :  { %v50_v36 = vld [vmem:[%s2930_s0 + $0x58] sm:$0xff]  ;;  %v99_v37 = vld [vmem:[%s2930_s0 + $0x1e0] sm:$0xff]  ;;  %v100_v40 = vld [vmem:[%s2930_s0 + $0x1e8] sm:$0xff] }
  0x13   :  { %1729 = vmatmul.msk.f32.gmra.mxu0 %vm112_vm1, %v40_v7  ;;  %1766 = vmatmul.msk.f32.gmra.mxu2 %vm112_vm1, %v77_v8  ;;  %v51_v38 = vld [vmem:[%s2930_s0 + $0x60] sm:$0xff]  ;;  %v52_v41 = vld [vmem:[%s2930_s0 + $0x68] sm:$0xff]  ;;  %v101_v43 = vld [vmem:[%s2930_s0 + $0x1f0] sm:$0xff] }
  0x14   :  { %v67_v39 = vld [vmem:[%s2930_s0 + $0xe0] sm:$0xff]  ;;  %v68_v42 = vld [vmem:[%s2930_s0 + $0xe8] sm:$0xff]  ;;  %v53_v44 = vld [vmem:[%s2930_s0 + $0x70] sm:$0xff] }
  0x15   :  { %1780 = vmatmul.msk.f32.gmra.mxu3 %vm112_vm1, %v91_v14  ;;  %1756 = vmatmul.msk.f32.vlgmr.msra.gmra.mxu1 %vm112_vm1, %v67_v39  ;;  %v69_v45 = vld [vmem:[%s2930_s0 + $0xf0] sm:$0xff]  ;;  %v102_v46 = vld [vmem:[%s2930_s0 + $0x1f8] sm:$0xff]  ;;  %v55_v50 = vld [vmem:[%s2930_s0 + $0x80] sm:$0xff] }
  0x16   :  { %v54_v47 = vld [vmem:[%s2930_s0 + $0x78] sm:$0xff]  ;;  %v71_v51 = vld [vmem:[%s2930_s0 + $0x100] sm:$0xff]  ;;  %v56_v54 = vld [vmem:[%s2930_s0 + $0x88] sm:$0xff] }
  0x17   :  { %v70_v48 = vld [vmem:[%s2930_s0 + $0xf8] sm:$0xff]  ;;  %v72_v55 = vld [vmem:[%s2930_s0 + $0x108] sm:$0xff]  ;;  %v57_v58 = vld [vmem:[%s2930_s0 + $0x90] sm:$0xff] }
  0x18   :  { %v73_v59 = vld [vmem:[%s2930_s0 + $0x110] sm:$0xff]  ;;  %v58_v62 = vld [vmem:[%s2930_s0 + $0x98] sm:$0xff]  ;;  %v59_v3 = vld [vmem:[%s2930_s0 + $0xa0] sm:$0xff] }
  0x19   :  { %v74_v0 = vld [vmem:[%s2930_s0 + $0x118] sm:$0xff]  ;;  %v75_v4 = vld [vmem:[%s2930_s0 + $0x120] sm:$0xff]  ;;  %v60_v8 = vld [vmem:[%s2930_s0 + $0xa8] sm:$0xff] }
  0x1a   :  { %v88_v14 = vld [vmem:[%s2930_s0 + $0x188] sm:$0xff] }
  0x1b   :  { %1730 = vmatmul.msk.f32.gmra.mxu0 %vm112_vm1, %v41_v9  ;;  %1767 = vmatmul.msk.f32.gmra.mxu2 %vm112_vm1, %v78_v10  ;;  %v87_v9 = vld [vmem:[%s2930_s0 + $0x180] sm:$0xff] }
  0x1d   :  { %1781 = vmatmul.msk.f32.gmra.mxu3 %vm112_vm1, %v92_v17  ;;  %1757 = vmatmul.msk.f32.gmra.mxu1 %vm112_vm1, %v68_v42 }
  0x23   :  { %1731 = vmatmul.msk.f32.gmra.mxu0 %vm112_vm1, %v42_v12  ;;  %1768 = vmatmul.msk.f32.gmra.mxu2 %vm112_vm1, %v79_v13  ;;  %v61_v13 = vld [vmem:[%s2930_s0 + $0xb0] sm:$0xff] }
  0x25   :  { %1782 = vmatmul.msk.f32.gmra.mxu3 %vm112_vm1, %v93_v20  ;;  %1758 = vmatmul.msk.f32.gmra.mxu1 %vm112_vm1, %v69_v45 }
  0x2b   :  { %1732 = vmatmul.msk.f32.gmra.mxu0 %vm112_vm1, %v43_v15  ;;  %1769 = vmatmul.msk.f32.gmra.mxu2 %vm112_vm1, %v80_v16 }
  0x2d   :  { %1783 = vmatmul.msk.f32.gmra.mxu3 %vm112_vm1, %v94_v23  ;;  %1759 = vmatmul.msk.f32.gmra.mxu1 %vm112_vm1, %v70_v48 }
  0x33   :  { %1733 = vmatmul.msk.f32.gmra.mxu0 %vm112_vm1, %v44_v18  ;;  %1770 = vmatmul.msk.f32.gmra.mxu2 %vm112_vm1, %v81_v19  ;;  %v62_v18 = vld [vmem:[%s2930_s0 + $0xb8] sm:$0xff]  ;;  %v89_v19 = vld [vmem:[%s2930_s0 + $0x190] sm:$0xff] }
  0x35   :  { %1784 = vmatmul.msk.f32.gmra.mxu3 %vm112_vm1, %v95_v26  ;;  %1760 = vmatmul.msk.f32.gmra.mxu1 %vm112_vm1, %v71_v51  ;;  %v64_v26 = vld [vmem:[%s2930_s0 + $0xc8] sm:$0xff] }
  0x3b   :  { %1734 = vmatmul.msk.f32.gmra.mxu0 %vm112_vm1, %v45_v21  ;;  %1771 = vmatmul.msk.f32.gmra.mxu2 %vm112_vm1, %v82_v22  ;;  %v63_v22 = vld [vmem:[%s2930_s0 + $0xc0] sm:$0xff] }
  0x3d   :  { %1785 = vmatmul.msk.f32.gmra.mxu3 %vm112_vm1, %v96_v29  ;;  %1761 = vmatmul.msk.f32.gmra.mxu1 %vm112_vm1, %v72_v55 }
  0x43   :  { %1735 = vmatmul.msk.f32.gmra.mxu0 %vm112_vm1, %v46_v24  ;;  %1772 = vmatmul.msk.f32.gmra.mxu2 %vm112_vm1, %v83_v25 }
  0x45   :  { %1786 = vmatmul.msk.f32.gmra.mxu3 %vm112_vm1, %v97_v32  ;;  %1762 = vmatmul.msk.f32.gmra.mxu1 %vm112_vm1, %v73_v59 }
  0x4b   :  { %1736 = vmatmul.msk.f32.gmra.mxu0 %vm112_vm1, %v47_v27  ;;  %1773 = vmatmul.msk.f32.gmra.mxu2 %vm112_vm1, %v84_v28 }
  0x4d   :  { %1787 = vmatmul.msk.f32.gmra.mxu3 %vm112_vm1, %v98_v35  ;;  %1763 = vmatmul.msk.f32.gmra.mxu1 %vm112_vm1, %v74_v0 }
  0x53   :  { %1737 = vmatmul.msk.f32.gmra.mxu0 %vm112_vm1, %v48_v30  ;;  %1774 = vmatmul.msk.f32.gmra.mxu2 %vm112_vm1, %v85_v31  ;;  %v65_v30 = vld [vmem:[%s2930_s0 + $0xd0] sm:$0xff]  ;;  %v2281_v31 = vld [vmem:[%s2933_s3] ss:$0 sm:$0xff] }
  0x55   :  { %1788 = vmatmul.msk.f32.gmra.mxu3 %vm112_vm1, %v99_v37  ;;  %1764 = vmatmul.msk.f32.gmra.mxu1 %vm112_vm1, %v75_v4 }
  0x5b   :  { %1738 = vmatmul.msk.f32.gmra.mxu0 %vm112_vm1, %v49_v33  ;;  %1775 = vmatmul.msk.f32.gmra.mxu2 %vm112_vm1, %v86_v34 }
  0x5d   :  { %1789 = vmatmul.msk.f32.gmra.mxu3 %vm112_vm1, %v100_v40 }
  0x63   :  { %1739 = vmatmul.msk.f32.gmra.mxu0 %vm112_vm1, %v50_v36  ;;  %1776 = vmatmul.msk.f32.gmra.mxu2 %vm112_vm1, %v87_v9 }
  0x65   :  { %1790 = vmatmul.msk.f32.gmra.mxu3 %vm112_vm1, %v101_v43 }
  0x6b   :  { %1740 = vmatmul.msk.f32.gmra.mxu0 %vm112_vm1, %v51_v38  ;;  %1777 = vmatmul.msk.f32.gmra.mxu2 %vm112_vm1, %v88_v14  ;;  %v66_v38 = vld [vmem:[%s2930_s0 + $0xd8] sm:$0xff] }
  0x6d   :  { %1791 = vmatmul.msk.f32.gmra.mxu3 %vm112_vm1, %v102_v46 }
  0x73   :  { %1741 = vmatmul.msk.f32.gmra.mxu0 %vm112_vm1, %v52_v41  ;;  %1778 = vmatmul.msk.f32.gmra.mxu2 %vm112_vm1, %v89_v19 }
  0x7b   :  { %1742 = vmatmul.msk.f32.gmra.mxu0 %vm112_vm1, %v53_v44 }
  0x83   :  { %1743 = vmatmul.msk.f32.gmra.mxu0 %vm112_vm1, %v54_v47 }
  0x88   :  { %v2161_v49 = vpop.f32.mrf.mxu0 }
  0x8b   :  { %1744 = vmatmul.msk.f32.gmra.mxu0 %vm112_vm1, %v55_v50 }
  0x8e   :  { %v2171_v52 = vpop.f32.mrf.mxu2 }
  0x90   :  { %v2173_v53 = vpop.f32.mrf.mxu0  ;;  %v2202_v63 = vpop.f32.mrf.mxu3 }
  0x92   :  { %v410_v51 = vpop.f32.mrf.mxu1 }
  0x93   :  { %1745 = vmatmul.msk.f32.gmra.mxu0 %vm112_vm1, %v56_v54 }
  0x96   :  { %v2183_v56 = vpop.f32.mrf.mxu2 }
  0x98   :  { %v2185_v57 = vpop.f32.mrf.mxu0  ;;  %v2220_v5 = vpop.f32.mrf.mxu3 }
  0x9b   :  { %1746 = vmatmul.msk.f32.gmra.mxu0 %vm112_vm1, %v57_v58 }
  0x9e   :  { %v2195_v60 = vpop.f32.mrf.mxu2 }
  0x9f   :  { %v444_v58 = vadd.f32 %v2281_v31, %v2195_v60 }
  0xa0   :  { %v2197_v61 = vpop.f32.mrf.mxu0  ;;  %v2232_v10 = vpop.f32.mrf.mxu3 }
  0xa1   :  { %v557_v4 = vmax.f32 %v444_v58, 0.0 }
  0xa3   :  { %1747 = vmatmul.msk.f32.gmra.mxu0 %vm112_vm1, %v58_v62  ;;  %v441_v62 = vadd.f32 %v2281_v31, %v2183_v56 }
  0xa6   :  { %v2209_v1 = vpop.f32.mrf.mxu2 }
  0xa7   :  { %v447_v54 = vadd.f32 %v2281_v31, %v2209_v1  ;;  %v556_v1 = vmax.f32 %v441_v62, 0.0 }
  0xa8   :  { %v2211_v2 = vpop.f32.mrf.mxu0  ;;  %v2245_v16 = vpop.f32.mrf.mxu3 }
  0xa9   :  { %v558_v0 = vmax.f32 %v447_v54, 0.0 }
  0xab   :  { %1748 = vmatmul.msk.f32.gmra.mxu0 %vm112_vm1, %v59_v3  ;;  %v438_v3 = vadd.f32 %v2281_v31, %v2171_v52 }
  0xad   :  { %v555_v60 = vmax.f32 %v438_v3, 0.0  ;;  %v336_v3 = vadd.f32 %v2281_v31, %v2197_v61  ;;  %v327_v61 = vadd.f32 %v2281_v31, %v2161_v49 }
  0xae   :  { %v449_v6 = vpop.f32.mrf.mxu2 }
  0xaf   :  { %v450_v46 = vadd.f32 %v2281_v31, %v449_v6 }
  0xb0   :  { %v2223_v7 = vpop.f32.mrf.mxu0  ;;  %v2262_v23 = vpop.f32.mrf.mxu3 }
  0xb1   :  { %v559_v59 = vmax.f32 %v450_v46, 0.0 }
  0xb3   :  { %1749 = vmatmul.msk.f32.gmra.mxu0 %vm112_vm1, %v60_v8  ;;  %v413_v8 = vpop.f32.mrf.mxu1 }
  0xb6   :  { %v452_v11 = vpop.f32.mrf.mxu2 }
  0xb7   :  { %v453_v44 = vadd.f32 %v2281_v31, %v452_v11 }
  0xb8   :  { %v2235_v12 = vpop.f32.mrf.mxu0  ;;  %v2271_v27 = vpop.f32.mrf.mxu3 }
  0xb9   :  { %v560_v55 = vmax.f32 %v453_v44, 0.0 }
  0xbb   :  { %1750 = vmatmul.msk.f32.gmra.mxu0 %vm112_vm1, %v61_v13  ;;  %v416_v13 = vpop.f32.mrf.mxu1 }
  0xbc   :  { %v417_v19 = vadd.f32 %v2281_v31, %v416_v13 }
  0xbe   :  { %v455_v15 = vpop.f32.mrf.mxu2 }
  0xbf   :  { %v456_v42 = vadd.f32 %v2281_v31, %v455_v15 }
  0xc0   :  { %v2247_v17 = vpop.f32.mrf.mxu0  ;;  %v2285_v33 = vpop.f32.mrf.mxu3 }
  0xc1   :  { %v561_v47 = vmax.f32 %v456_v42, 0.0 }
  0xc3   :  { %1751 = vmatmul.msk.f32.gmra.mxu0 %vm112_vm1, %v62_v18  ;;  %v419_v15 = vpop.f32.mrf.mxu1 }
  0xc6   :  { %v458_v20 = vpop.f32.mrf.mxu2 }
  0xc7   :  { %v459_v39 = vadd.f32 %v2281_v31, %v458_v20 }
  0xc8   :  { %v2257_v21 = vpop.f32.mrf.mxu0  ;;  %v2297_v48 = vpop.f32.mrf.mxu3 }
  0xc9   :  { %v562_v45 = vmax.f32 %v459_v39, 0.0 }
  0xcb   :  { %1752 = vmatmul.msk.f32.gmra.mxu0 %vm112_vm1, %v63_v22  ;;  %v2322_v42 = vpop.f32.mrf.mxu1 }
  0xce   :  { %v461_v24 = vpop.f32.mrf.mxu2 }
  0xcf   :  { %v462_v35 = vadd.f32 %v2281_v31, %v461_v24  ;;  %v414_v24 = vadd.f32 %v2281_v31, %v413_v8  ;;  %v333_v8 = vadd.f32 %v2281_v31, %v2185_v57 }
  0xd0   :  { %v2265_v25 = vpop.f32.mrf.mxu0  ;;  %v2307_v9 = vpop.f32.mrf.mxu3 }
  0xd1   :  { %v563_v43 = vmax.f32 %v462_v35, 0.0  ;;  %v548_v35 = vmax.f32 %v417_v19, 0.0  ;;  %v354_v46 = vadd.f32 %v2281_v31, %v2265_v25  ;;  %v345_v25 = vadd.f32 %v2281_v31, %v2235_v12 }
  0xd2   :  { %v520_v13 = vmax.f32 %v333_v8, 0.0  ;;  %v504_v49 = vadd.f32 %v2281_v31, %v2307_v9 }
  0xd3   :  { %1753 = vmatmul.msk.f32.gmra.mxu0 %vm112_vm1, %v64_v26  ;;  %v420_v26 = vadd.f32 %v2281_v31, %v419_v15  ;;  %v2334_v58 = vpop.f32.mrf.mxu1 }
  0xd6   :  { %v464_v28 = vpop.f32.mrf.mxu2 }
  0xd7   :  { %v465_v32 = vadd.f32 %v2281_v31, %v464_v28 }
  0xd8   :  { %v2273_v29 = vpop.f32.mrf.mxu0  ;;  %v2309_v56 = vpop.f32.mrf.mxu3 }
  0xd9   :  { %v564_v40 = vmax.f32 %v465_v32, 0.0  ;;  %v411_v32 = vadd.f32 %v2281_v31, %v410_v51  ;;  %v348_v51 = vadd.f32 %v2281_v31, %v2247_v17  ;;  %v339_v17 = vadd.f32 %v2281_v31, %v2211_v2 }
  0xda   :  { %v521_v2 = vmax.f32 %v336_v3, 0.0 }
  0xdb   :  { %1754 = vmatmul.msk.f32.gmra.mxu0 %vm112_vm1, %v65_v30  ;;  %v525_v62 = vmax.f32 %v348_v51, 0.0  ;;  %v428_v12 = vpop.f32.mrf.mxu1  ;;  %v486_v51 = vadd.f32 %v2281_v31, %v2232_v10 }
  0xde   :  { %v467_v34 = vpop.f32.mrf.mxu2 }
  0xdf   :  { %v468_v36 = vadd.f32 %v2281_v31, %v467_v34 }
  0xe0   :  { %v359_v37 = vpop.f32.mrf.mxu0  ;;  %v509_v34 = vpop.f32.mrf.mxu3 }
  0xe1   :  { %v565_v41 = vmax.f32 %v468_v36, 0.0  ;;  %v549_v36 = vmax.f32 %v420_v26, 0.0  ;;  %v510_v57 = vadd.f32 %v2281_v31, %v509_v34  ;;  %v501_v26 = vadd.f32 %v2281_v31, %v2297_v48 }
  0xe2   :  { %v495_v48 = vadd.f32 %v2281_v31, %v2271_v27  ;;  %v489_v27 = vadd.f32 %v2281_v31, %v2245_v16  ;;  %v480_v16 = vadd.f32 %v2281_v31, %v2202_v63 }
  0xe3   :  { %1755 = vmatmul.msk.f32.gmra.mxu0 %vm112_vm1, %v66_v38  ;;  %633 = vmatpush.msrb.mxu3 %v565_v41  ;;  %v360_v38 = vadd.f32 %v2281_v31, %v359_v37  ;;  %v351_v37 = vadd.f32 %v2281_v31, %v2257_v21  ;;  %v342_v21 = vadd.f32 %v2281_v31, %v2223_v7  ;;  %v431_v19 = vpop.f32.mrf.mxu1 }
  0xe4   :  { %613 = vmatpush.msrb.mxu2 %v549_v36  ;;  %v576_v36 = vmax.f32 %v501_v26, 0.0  ;;  %v432_v9 = vadd.f32 %v2281_v31, %v431_v19 }
  0xe5   :  { %634 = vmatpush.msrb.mxu3 %v564_v40  ;;  %v547_v40 = vmax.f32 %v414_v24, 0.0  ;;  %v579_v24 = vmax.f32 %v510_v57, 0.0 }
  0xe6   :  { %614 = vmatpush.msrb.mxu2 %v548_v35 }
  0xe7   :  { %635 = vmatpush.msrb.mxu3 %v563_v43  ;;  %v357_v43 = vadd.f32 %v2281_v31, %v2273_v29  ;;  %v527_v29 = vmax.f32 %v354_v46, 0.0 }
  0xe8   :  { %v362_v50 = vpop.f32.mrf.mxu0  ;;  %615 = vmatpush.msrb.mxu2 %v547_v40  ;;  %v512_v54 = vpop.f32.mrf.mxu3  ;;  %v429_v40 = vadd.f32 %v2281_v31, %v428_v12 }
  0xe9   :  { %636 = vmatpush.msrb.mxu3 %v562_v45  ;;  %v363_v28 = vadd.f32 %v2281_v31, %v362_v50  ;;  %v546_v45 = vmax.f32 %v411_v32, 0.0  ;;  %v528_v50 = vmax.f32 %v357_v43, 0.0  ;;  %v577_v32 = vmax.f32 %v504_v49, 0.0 }
  0xea   :  { %v553_v43 = vmax.f32 %v432_v9, 0.0  ;;  %v552_v46 = vmax.f32 %v429_v40, 0.0 }
  0xeb   :  { %637 = vmatpush.msrb.mxu3 %v561_v47  ;;  %v530_v44 = vmax.f32 %v363_v28, 0.0  ;;  %v529_v47 = vmax.f32 %v360_v38, 0.0  ;;  %616 = vmatpush.msrb.mxu2 %v546_v45  ;;  %v426_v45 = vadd.f32 %v2281_v31, %v2334_v58  ;;  %v571_v58 = vmax.f32 %v486_v51, 0.0 }
  0xed   :  { %638 = vmatpush.msrb.mxu3 %v560_v55 }
  0xef   :  { %639 = vmatpush.msrb.mxu3 %v559_v59  ;;  %v526_v59 = vmax.f32 %v351_v37, 0.0 }
  0xf0   :  { %v365_v6 = vpop.f32.mrf.mxu0  ;;  %v515_v7 = vpop.f32.mrf.mxu3 }
  0xf1   :  { %640 = vmatpush.msrb.mxu3 %v558_v0  ;;  %v366_v20 = vadd.f32 %v2281_v31, %v365_v6  ;;  %v524_v0 = vmax.f32 %v345_v25, 0.0 }
  0xf3   :  { %641 = vmatpush.msrb.mxu3 %v557_v4  ;;  %v531_v39 = vmax.f32 %v366_v20, 0.0  ;;  %v523_v4 = vmax.f32 %v342_v21, 0.0  ;;  %v507_v20 = vadd.f32 %v2281_v31, %v2309_v56  ;;  %v434_v56 = vpop.f32.mrf.mxu1  ;;  %v470_v21 = vpop.f32.mrf.mxu2 }
  0xf4   :  { %v435_v35 = vadd.f32 %v2281_v31, %v434_v56 }
  0xf5   :  { %642 = vmatpush.msrb.mxu3 %v556_v1  ;;  %v522_v1 = vmax.f32 %v339_v17, 0.0  ;;  %v578_v28 = vmax.f32 %v507_v20, 0.0 }
  0xf6   :  { %v554_v38 = vmax.f32 %v435_v35, 0.0 }
  0xf7   :  { %643 = vmatpush.msrb.mxu3 %v555_v60  ;;  %v330_v60 = vadd.f32 %v2281_v31, %v2173_v53  ;;  %v518_v53 = vmax.f32 %v327_v61, 0.0 }
  0xf8   :  { %v368_v11 = vpop.f32.mrf.mxu0 }
  0xf9   :  { %v369_v52 = vadd.f32 %v2281_v31, %v368_v11  ;;  %v516_v11 = vadd.f32 %v2281_v31, %v515_v7  ;;  %v519_v15 = vmax.f32 %v330_v60, 0.0  ;;  %644 = vmatpush.msrb.mxu3 %v554_v38  ;;  %v582_v60 = vld [vmem:[%s2931_s1] sm:$0xff] }
  0xfa   :  { %584 = vst [vmem:[#allocation1] ss:$4 sm:$0xff] %v582_v60 }
  0xfb   :  { %v532_v30 = vmax.f32 %v369_v52, 0.0  ;;  %645 = vmatpush.msrb.mxu3 %v553_v43  ;;  %v473_v17 = vpop.f32.mrf.mxu2 }
  0xfc   :  { %v474_v12 = vadd.f32 %v2281_v31, %v473_v17 }
  0xfd   :  { %646 = vmatpush.msrb.mxu3 %v552_v46 }
 0x100   :  { %v371_v14 = vpop.f32.mrf.mxu0 }
 0x101   :  { %v372_v18 = vadd.f32 %v2281_v31, %v371_v14  ;;  %v513_v14 = vadd.f32 %v2281_v31, %v512_v54  ;;  %v572_v54 = vmax.f32 %v489_v27, 0.0  ;;  %v587_v61 = vld.sshfl [vmem:[#allocation1 + $0x10] sm:$0xff pattern:$0x73625140] }
 0x102   :  { %v588_v57 = vld.sshfl [vmem:[#allocation1 + $0x18] sm:$0xff pattern:$0x73625140]  ;;  %v586_v43 = vld.sshfl [vmem:[#allocation1 + $0x8] sm:$0xff pattern:$0x73625140] }
 0x103   :  { %v533_v22 = vmax.f32 %v372_v18, 0.0  ;;  %v581_v18 = vmax.f32 %v516_v11, 0.0  ;;  %v476_v3 = vpop.f32.mrf.mxu2  ;;  %v585_v11 = vld.sshfl [vmem:[#allocation1] sm:$0xff pattern:$0x73625140] }
 0x105   :  { %593 = vmatpush.msrb.mxu1 %v533_v22  ;;  %v580_v22 = vmax.f32 %v513_v14, 0.0 }
 0x107   :  { %594 = vmatpush.msrb.mxu1 %v532_v30  ;;  %v498_v30 = vadd.f32 %v2281_v31, %v2285_v33  ;;  %v423_v33 = vadd.f32 %v2281_v31, %v2322_v42 }
 0x108   :  { %v2320_v41 = vpop.f32.mrf.mxu0 }
 0x109   :  { %595 = vmatpush.msrb.mxu1 %v531_v39  ;;  %v575_v39 = vmax.f32 %v498_v30, 0.0  ;;  %v550_v42 = vmax.f32 %v423_v33, 0.0 }
 0x10b   :  { %596 = vmatpush.msrb.mxu1 %v530_v44  ;;  %v492_v44 = vadd.f32 %v2281_v31, %v2262_v23  ;;  %v483_v23 = vadd.f32 %v2281_v31, %v2220_v5  ;;  %v477_v5 = vadd.f32 %v2281_v31, %v476_v3 }
 0x10d   :  { %597 = vmatpush.msrb.mxu1 %v529_v47  ;;  %v574_v47 = vmax.f32 %v495_v48, 0.0  ;;  %v570_v25 = vmax.f32 %v483_v23, 0.0  ;;  %v568_v63 = vmax.f32 %v477_v5, 0.0 }
 0x10f   :  { %598 = vmatpush.msrb.mxu1 %v528_v50  ;;  %v551_v50 = vmax.f32 %v426_v45, 0.0  ;;  %v1903_v45 = vmov 2.0  }
 0x110   :  { %v2332_v55 = vpop.f32.mrf.mxu0  ;;  %1847 = vrcp.f32 %v1903_v45 }
 0x111   :  { %599 = vmatpush.msrb.mxu1 %v527_v29  ;;  %v573_v29 = vmax.f32 %v492_v44, 0.0  ;;  %647 = vmatpush.msrb.mxu3 %v551_v50  ;;  %v378_v48 = vadd.f32 %v2281_v31, %v2332_v55  ;;  %v675_v55 = vld [vmem:[%s2934_s4 + $0x10] sm:$0xff] }
 0x113   :  { %600 = vmatpush.msrb.mxu1 %v526_v59  ;;  %648 = vmatpush.msrb.mxu3 %v550_v42  ;;  %v535_v40 = vmax.f32 %v378_v48, 0.0  ;;  %v756_v48 = vld [vmem:[%s2938_s8 + $0x10] sm:$0xff] }
 0x114   :  { %649 = vmatmul.f32.vlgmr.msrb.gmra.mxu3 %v587_v61  ;;  %v825_v61 = vld [vmem:[%s2938_s8 + $0x238] sm:$0xff] }
 0x115   :  { %601 = vmatpush.msrb.mxu1 %v525_v62  ;;  %v569_v62 = vmax.f32 %v480_v16, 0.0 }
 0x116   :  { %v1848_v46 = vpop.eup %1847 }
 0x117   :  { %602 = vmatpush.msrb.mxu1 %v524_v0  ;;  %v715_v42 = vmul.f32 2.0, %v1848_v46  ;;  %vm719_vm4 = vweird.f32 %v1848_v46 }
 0x118   :  { %v2344_v6 = vpop.f32.mrf.mxu0 }
 0x119   :  { %603 = vmatpush.msrb.mxu1 %v523_v4  ;;  %v471_v4 = vadd.f32 %v2281_v31, %v470_v21  ;;  %v381_v9 = vadd.f32 %v2281_v31, %v2344_v6  ;;  %v676_v6 = vld [vmem:[%s2934_s4 + $0x18] sm:$0xff]  ;;  %v716_v23 = vsub.f32 1.0, %v715_v42  ;;  %v855_v42 = vld [vmem:[%s2938_s8 + $0x328] sm:$0xff] }
 0x11b   :  { %604 = vmatpush.msrb.mxu1 %v522_v1  ;;  %v566_v8 = vmax.f32 %v471_v4, 0.0  ;;  %v567_v1 = vmax.f32 %v474_v12, 0.0  ;;  %v536_v33 = vmax.f32 %v381_v9, 0.0 }
 0x11d   :  { %605 = vmatpush.msrb.mxu1 %v521_v2 }
 0x11f   :  { %606 = vmatpush.msrb.mxu1 %v520_v13 }
 0x120   :  { %v2355_v52 = vpop.f32.mrf.mxu0 }
 0x121   :  { %607 = vmatpush.msrb.mxu1 %v519_v15  ;;  %v384_v35 = vadd.f32 %v2281_v31, %v2355_v52 }
 0x123   :  { %608 = vmatpush.msrb.mxu1 %v518_v53 }
 0x124   :  { %609 = vmatmul.f32.vlgmr.msrb.gmra.mxu1 %v585_v11  ;;  %v819_v11 = vld [vmem:[%s2938_s8 + $0x208] sm:$0xff] }
 0x125   :  { %653 = vmatpush.msra.mxu1 %v581_v18 }
 0x127   :  { %654 = vmatpush.msra.mxu1 %v580_v22 }
 0x128   :  { %v2365_v34 = vpop.f32.mrf.mxu0 }
 0x129   :  { %655 = vmatpush.msra.mxu1 %v579_v24 }
 0x12b   :  { %656 = vmatpush.msra.mxu1 %v578_v28 }
 0x12d   :  { %657 = vmatpush.msra.mxu1 %v577_v32  ;;  %v387_v32 = vadd.f32 %v2281_v31, %v2365_v34  ;;  %v375_v34 = vadd.f32 %v2281_v31, %v2320_v41  ;;  %v673_v41 = vld [vmem:[%s2934_s4] sm:$0xff] }
 0x12f   :  { %658 = vmatpush.msra.mxu1 %v576_v36  ;;  %v538_v38 = vmax.f32 %v387_v32, 0.0  ;;  %v534_v52 = vmax.f32 %v375_v34, 0.0  ;;  %v821_v32 = vld [vmem:[%s2938_s8 + $0x218] sm:$0xff] }
 0x130   :  { %v389_v37 = vpop.f32.mrf.mxu0 }
 0x131   :  { %659 = vmatpush.msra.mxu1 %v575_v39  ;;  %v390_v28 = vadd.f32 %v2281_v31, %v389_v37  ;;  %v537_v39 = vmax.f32 %v384_v35, 0.0  ;;  %v788_v35 = vld [vmem:[%s2938_s8 + $0x110] sm:$0xff] }
 0x133   :  { %660 = vmatpush.msra.mxu1 %v574_v47  ;;  %v539_v36 = vmax.f32 %v390_v28, 0.0 }
 0x135   :  { %661 = vmatpush.msra.mxu1 %v573_v29 }
 0x137   :  { %662 = vmatpush.msra.mxu1 %v572_v54 }
 0x138   :  { %v392_v59 = vpop.f32.mrf.mxu0 }
 0x139   :  { %663 = vmatpush.msra.mxu1 %v571_v58  ;;  %v393_v24 = vadd.f32 %v2281_v31, %v392_v59  ;;  %v717_v58 = vmul.f32 %v1848_v46, %v716_v23  ;;  %v831_v23 = vld [vmem:[%s2938_s8 + $0x268] sm:$0xff] }
 0x13b   :  { %664 = vmatpush.msra.mxu1 %v570_v25  ;;  %v540_v56 = vmax.f32 %v393_v24, 0.0  ;;  %v718_v21 = vadd.f32 %v1848_v46, %v717_v58  ;;  %v853_v24 = vld [vmem:[%s2938_s8 + $0x318] sm:$0xff]  ;;  %v799_v58 = vld [vmem:[%s2938_s8 + $0x168] sm:$0xff] }
 0x13d   :  { %665 = vmatpush.msra.mxu1 %v569_v62  ;;  %v720_v17 = vsel %vm719_vm4, %v1848_v46, %v718_v21  ;;  %v1845_v46 = vld [vmem:[%s2937_s7] ss:$0 sm:$0xff]  ;;  %v767_v21 = vld [vmem:[%s2938_s8 + $0x68] sm:$0xff] }
 0x13f   :  { %666 = vmatpush.msra.mxu1 %v568_v63 }
 0x140   :  { %v395_v10 = vpop.f32.mrf.mxu0 }
 0x141   :  { %667 = vmatpush.msra.mxu1 %v567_v1  ;;  %v396_v22 = vadd.f32 %v2281_v31, %v395_v10  ;;  %v851_v1 = vld [vmem:[%s2938_s8 + $0x308] sm:$0xff] }
 0x143   :  { %668 = vmatpush.msra.mxu1 %v566_v8  ;;  %v541_v30 = vmax.f32 %v396_v22, 0.0  ;;  %v850_v8 = vld [vmem:[%s2938_s8 + $0x300] sm:$0xff] }
 0x144   :  { %669 = vmatmul.f32.vlgmr.msra.gmra.mxu1 %v588_v57  ;;  %969 = vmatpush.msra.mxu3 %v850_v8  ;;  %v793_v57 = vld [vmem:[%s2938_s8 + $0x138] sm:$0xff]  ;;  %v760_v8 = vld [vmem:[%s2938_s8 + $0x30] sm:$0xff] }
 0x148   :  { %v398_v0 = vpop.f32.mrf.mxu0 }
 0x149   :  { %v399_v53 = vadd.f32 %v2281_v31, %v398_v0 }
 0x14b   :  { %v542_v26 = vmax.f32 %v399_v53, 0.0  ;;  %v755_v53 = vld [vmem:[%s2938_s8 + $0x8] sm:$0xff] }
 0x150   :  { %v401_v7 = vpop.f32.mrf.mxu0 }
 0x151   :  { %v402_v18 = vadd.f32 %v2281_v31, %v401_v7  ;;  %v857_v7 = vld [vmem:[%s2938_s8 + $0x338] sm:$0xff] }
 0x152   :  { %1109 = vmatpush.msrb.mxu1 %v857_v7  ;;  %v770_v7 = vld [vmem:[%s2938_s8 + $0x80] sm:$0xff] }
 0x153   :  { %v543_v49 = vmax.f32 %v402_v18, 0.0 }
 0x154   :  { %1110 = vmatpush.msrb.mxu1 %v825_v61  ;;  %v827_v61 = vld [vmem:[%s2938_s8 + $0x248] sm:$0xff] }
 0x156   :  { %1111 = vmatpush.msrb.mxu1 %v793_v57  ;;  %v797_v57 = vld [vmem:[%s2938_s8 + $0x158] sm:$0xff] }
 0x158   :  { %v404_v2 = vpop.f32.mrf.mxu0 }
 0x159   :  { %v405_v14 = vadd.f32 %v2281_v31, %v404_v2  ;;  %v818_v2 = vld [vmem:[%s2938_s8 + $0x200] sm:$0xff] }
 0x15a   :  { %970 = vmatpush.msra.mxu3 %v818_v2  ;;  %v861_v2 = vld [vmem:[%s2938_s8 + $0x358] sm:$0xff] }
 0x15b   :  { %v544_v20 = vmax.f32 %v405_v14, 0.0  ;;  %v786_v14 = vld [vmem:[%s2938_s8 + $0x100] sm:$0xff] }
 0x15c   :  { %971 = vmatpush.msra.mxu3 %v786_v14  ;;  %v837_v14 = vld [vmem:[%s2938_s8 + $0x298] sm:$0xff] }
 0x160   :  { %v407_v13 = vpop.f32.mrf.mxu0 }
 0x161   :  { %v408_v15 = vadd.f32 %v2281_v31, %v407_v13  ;;  %v674_v31 = vld [vmem:[%s2934_s4 + $0x8] sm:$0xff] }
 0x163   :  { %v545_v19 = vmax.f32 %v408_v15, 0.0  ;;  %v787_v15 = vld [vmem:[%s2938_s8 + $0x108] sm:$0xff] }
 0x165   :  { %617 = vmatpush.msrb.mxu2 %v545_v19  ;;  %v754_v19 = vld [vmem:[%s2938_s8] sm:$0xff] }
 0x166   :  { %972 = vmatpush.msra.mxu3 %v754_v19  ;;  %v805_v19 = vld [vmem:[%s2938_s8 + $0x198] sm:$0xff] }
 0x167   :  { %618 = vmatpush.msrb.mxu2 %v544_v20  ;;  %v761_v20 = vld [vmem:[%s2938_s8 + $0x38] sm:$0xff] }
 0x168   :  { %1112 = vmatpush.msrb.mxu1 %v761_v20  ;;  %v862_v20 = vld [vmem:[%s2938_s8 + $0x360] sm:$0xff] }
 0x169   :  { %619 = vmatpush.msrb.mxu2 %v543_v49  ;;  %v852_v49 = vld [vmem:[%s2938_s8 + $0x310] sm:$0xff] }
 0x16a   :  { %1009 = vmatpush.msrb.mxu3 %v852_v49  ;;  %v773_v49 = vld [vmem:[%s2938_s8 + $0x98] sm:$0xff] }
 0x16b   :  { %620 = vmatpush.msrb.mxu2 %v542_v26  ;;  %v860_v26 = vld [vmem:[%s2938_s8 + $0x350] sm:$0xff] }
 0x16c   :  { %1169 = vmatpush.msra.mxu1 %v860_v26  ;;  %v830_v26 = vld [vmem:[%s2938_s8 + $0x260] sm:$0xff] }
 0x16d   :  { %621 = vmatpush.msrb.mxu2 %v541_v30  ;;  %v820_v30 = vld [vmem:[%s2938_s8 + $0x210] sm:$0xff] }
 0x16e   :  { %1010 = vmatpush.msrb.mxu3 %v820_v30  ;;  %v840_v30 = vld [vmem:[%s2938_s8 + $0x2b0] sm:$0xff] }
 0x16f   :  { %622 = vmatpush.msrb.mxu2 %v540_v56  ;;  %v828_v56 = vld [vmem:[%s2938_s8 + $0x250] sm:$0xff] }
 0x170   :  { %1170 = vmatpush.msra.mxu1 %v828_v56  ;;  %1011 = vmatpush.msrb.mxu3 %v788_v35  ;;  %v800_v56 = vld [vmem:[%s2938_s8 + $0x170] sm:$0xff] }
 0x171   :  { %623 = vmatpush.msrb.mxu2 %v539_v36  ;;  %v789_v36 = vld [vmem:[%s2938_s8 + $0x118] sm:$0xff]  ;;  %v808_v35 = vld [vmem:[%s2938_s8 + $0x1b0] sm:$0xff] }
 0x172   :  { %1012 = vmatpush.msrb.mxu3 %v756_v48  ;;  %v776_v48 = vld [vmem:[%s2938_s8 + $0xb0] sm:$0xff] }
 0x173   :  { %624 = vmatpush.msrb.mxu2 %v538_v38  ;;  %v796_v38 = vld [vmem:[%s2938_s8 + $0x150] sm:$0xff] }
 0x174   :  { %1171 = vmatpush.msra.mxu1 %v796_v38  ;;  %v865_v38 = vld [vmem:[%s2938_s8 + $0x378] sm:$0xff] }
 0x175   :  { %625 = vmatpush.msrb.mxu2 %v537_v39  ;;  %v757_v39 = vld [vmem:[%s2938_s8 + $0x18] sm:$0xff] }
 0x177   :  { %626 = vmatpush.msrb.mxu2 %v536_v33  ;;  %v764_v33 = vld [vmem:[%s2938_s8 + $0x50] sm:$0xff] }
 0x178   :  { %1172 = vmatpush.msra.mxu1 %v764_v33  ;;  %v833_v33 = vld [vmem:[%s2938_s8 + $0x278] sm:$0xff] }
 0x179   :  { %627 = vmatpush.msrb.mxu2 %v535_v40 }
 0x17b   :  { %628 = vmatpush.msrb.mxu2 %v534_v52 }
 0x17c   :  { %629 = vmatmul.f32.vlgmr.msrb.gmra.mxu2 %v586_v43 }
 0x17d   :  { %697 = vmatpush.msra.mxu2 %v676_v6 }
 0x17f   :  { %698 = vmatpush.msra.mxu2 %v675_v55 }
 0x181   :  { %699 = vmatpush.msra.mxu2 %v674_v31 }
 0x183   :  { %700 = vmatpush.msra.mxu2 %v673_v41  ;;  %v1844_v41 = vld [vmem:[%s2936_s6] ss:$0 sm:$0xff]  ;;  %s1702_s6 = sshll.u32 %s2940_s10, 4  ;;  %s1703_s6 = int_to_ptr.hbm [resolvable:$true] %s1702_s6 }
 0x185   :  { %989 = vmatpush.msrb.mxu2 %v851_v1  ;;  %v762_v1 = vld [vmem:[%s2938_s8 + $0x40] sm:$0xff] }
 0x187   :  { %990 = vmatpush.msrb.mxu2 %v819_v11  ;;  %v869_v11 = vld [vmem:[%s2938_s8 + $0x398] sm:$0xff] }
 0x189   :  { %991 = vmatpush.msrb.mxu2 %v787_v15  ;;  %v795_v15 = vld [vmem:[%s2938_s8 + $0x148] sm:$0xff] }
 0x18b   :  { %992 = vmatpush.msrb.mxu2 %v755_v53  ;;  %v765_v53 = vld [vmem:[%s2938_s8 + $0x58] sm:$0xff] }
 0x197   :  { %v650_v47 = vpop.f32.mrf.mxu3 }
 0x1a1   :  { %v610_v44 = vpop.f32.mrf.mxu1 }
 0x1c1   :  { %v670_v50 = vpop.f32.mrf.mxu1 }
 0x1ff   :  { %v630_v27 = vpop.f32.mrf.mxu2 }
 0x200   :  { %v631_v37 = vadd.f32 %v630_v27, %v610_v44 }
 0x202   :  { %v651_v51 = vadd.f32 %v650_v47, %v631_v37  ;;  %v854_v37 = vld [vmem:[%s2938_s8 + $0x320] sm:$0xff] }
 0x204   :  { %v671_v29 = vadd.f32 %v670_v50, %v651_v51  ;;  %v863_v50 = vld [vmem:[%s2938_s8 + $0x368] sm:$0xff]  ;;  %v822_v51 = vld [vmem:[%s2938_s8 + $0x220] sm:$0xff] }
 0x206   :  { %v707_v54 = vsel %vm706_vm2, %v671_v29, 0.0  ;;  %1792 = vmatmul.msk.f32.vlgmr.msra.gmra.mxu2 %vm681_vm3, %v671_v29 }
 0x207   :  { %v708_v16 = vrot.slane %v707_v54, 4  ;;  %1029 = vmatpush.msra.mxu2 %v853_v24  ;;  %v872_v24 = vld [vmem:[%s2938_s8 + $0x3b0] sm:$0xff] }
 0x209   :  { %v709_v25 = vadd.f32 %v708_v16, %v707_v54  ;;  %1030 = vmatpush.msra.mxu2 %v821_v32  ;;  %v790_v54 = vld [vmem:[%s2938_s8 + $0x120] sm:$0xff]  ;;  %v791_v16 = vld [vmem:[%s2938_s8 + $0x128] sm:$0xff] }
 0x20a   :  { %v798_v32 = vld [vmem:[%s2938_s8 + $0x160] sm:$0xff] }
 0x20b   :  { %v710_v59 = vrot.slane %v709_v25, 2  ;;  %1031 = vmatpush.msra.mxu2 %v789_v36  ;;  %v766_v36 = vld [vmem:[%s2938_s8 + $0x60] sm:$0xff] }
 0x20d   :  { %v711_v62 = vadd.f32 %v710_v59, %v709_v25  ;;  %1032 = vmatpush.msra.mxu2 %v757_v39  ;;  %v758_v25 = vld [vmem:[%s2938_s8 + $0x20] sm:$0xff]  ;;  %v759_v59 = vld [vmem:[%s2938_s8 + $0x28] sm:$0xff] }
 0x20e   :  { %v867_v39 = vld [vmem:[%s2938_s8 + $0x388] sm:$0xff] }
 0x20f   :  { %v712_v10 = vrot.slane %v711_v62, 1 }
 0x211   :  { %v713_v0 = vadd.f32 %v712_v10, %v711_v62  ;;  %v856_v62 = vld [vmem:[%s2938_s8 + $0x330] sm:$0xff]  ;;  %v858_v10 = vld [vmem:[%s2938_s8 + $0x340] sm:$0xff] }
 0x213   :  { %v721_v3 = vmul.f32 %v720_v17, %v713_v0  ;;  %v824_v0 = vld [vmem:[%s2938_s8 + $0x230] sm:$0xff] }
 0x215   :  { %v2423_v5 = vsub.f32 %v671_v29, %v721_v3  ;;  %v823_v29 = vld [vmem:[%s2938_s8 + $0x228] sm:$0xff]  ;;  %v826_v3 = vld [vmem:[%s2938_s8 + $0x240] sm:$0xff] }
 0x217   :  { %v723_v4 = vmul.f32 %v2423_v5, %v2423_v5 }
 0x219   :  { %v724_v12 = vsel %vm706_vm2, %v723_v4, 0.0  ;;  %v792_v4 = vld [vmem:[%s2938_s8 + $0x130] sm:$0xff] }
 0x21a   :  { %v725_v63 = vrot.slane %v724_v12, 4 }
 0x21c   :  { %v726_v60 = vadd.f32 %v725_v63, %v724_v12  ;;  %v794_v12 = vld [vmem:[%s2938_s8 + $0x140] sm:$0xff] }
 0x21d   :  { %v802_v63 = vld [vmem:[%s2938_s8 + $0x180] sm:$0xff] }
 0x21e   :  { %v727_v13 = vrot.slane %v726_v60, 2 }
 0x220   :  { %v728_v18 = vadd.f32 %v727_v13, %v726_v60  ;;  %v859_v60 = vld [vmem:[%s2938_s8 + $0x348] sm:$0xff]  ;;  %v829_v13 = vld [vmem:[%s2938_s8 + $0x258] sm:$0xff] }
 0x222   :  { %v729_v22 = vrot.slane %v728_v18, 1 }
 0x224   :  { %v730_v28 = vadd.f32 %v729_v22, %v728_v18  ;;  %v763_v18 = vld [vmem:[%s2938_s8 + $0x48] sm:$0xff]  ;;  %v864_v22 = vld [vmem:[%s2938_s8 + $0x370] sm:$0xff] }
 0x226   :  { %v731_v9 = vmul.f32 %v730_v28, %v720_v17  ;;  %v866_v17 = vld [vmem:[%s2938_s8 + $0x380] sm:$0xff]  ;;  %v832_v28 = vld [vmem:[%s2938_s8 + $0x270] sm:$0xff] }
 0x228   :  { %v732_v34 = vadd.f32 1e-05, %v731_v9  ;;  %v768_v9 = vld [vmem:[%s2938_s8 + $0x70] sm:$0xff] }
 0x22a   :  { %1849 = vrsqrt.f32 %v732_v34  ;;  %vm739_vm6 = vweird.f32 %v732_v34 }
 0x230   :  { %v1850_v40 = vpop.eup %1849 }
 0x231   :  { %v734_v52 = vmul.f32 %v1850_v40, %v732_v34  ;;  %vm740_vm5 = vweird.f32 %v1850_v40  ;;  %v875_v34 = vld [vmem:[%s2938_s8 + $0x3c8] sm:$0xff] }
 0x232   :  { %vm741_vm7 = vmor %vm739_vm6, %vm740_vm5 }
 0x233   :  { %v735_v43 = vmul.f32 %v1850_v40, %v734_v52  ;;  %v843_v52 = vld [vmem:[%s2938_s8 + $0x2c8] sm:$0xff] }
 0x235   :  { %v736_v6 = vmul.f32 0.5, %v735_v43  ;;  %v801_v43 = vld [vmem:[%s2938_s8 + $0x178] sm:$0xff] }
 0x237   :  { %v737_v55 = vsub.f32 1.5, %v736_v6  ;;  %v803_v6 = vld [vmem:[%s2938_s8 + $0x188] sm:$0xff] }
 0x239   :  { %v738_v31 = vmul.f32 %v1850_v40, %v737_v55  ;;  %v811_v55 = vld [vmem:[%s2938_s8 + $0x1c8] sm:$0xff] }
 0x23b   :  { %v742_v44 = vsel %vm741_vm7, %v1850_v40, %v738_v31  ;;  %v835_v40 = vld [vmem:[%s2938_s8 + $0x288] sm:$0xff]  ;;  %v769_v31 = vld [vmem:[%s2938_s8 + $0x78] sm:$0xff] }
 0x23c   :  { %v743_v45 = vmul.f32 %v742_v44, %v2423_v5  ;;  %v834_v5 = vld [vmem:[%s2938_s8 + $0x280] sm:$0xff]  ;;  %v868_v44 = vld [vmem:[%s2938_s8 + $0x390] sm:$0xff] }
 0x23e   :  { %v748_v27 = vmul.f32 %v1844_v41, %v743_v45  ;;  %v771_v41 = vld [vmem:[%s2938_s8 + $0x88] sm:$0xff] }
 0x23f   :  { %v779_v45 = vld [vmem:[%s2938_s8 + $0xc8] sm:$0xff] }
 0x240   :  { %v2507_v47 = vadd.f32 %v1845_v46, %v748_v27  ;;  %v870_v46 = vld [vmem:[%s2938_s8 + $0x3a0] sm:$0xff] }
 0x241   :  { %v878_v27 = vld [vmem:[%s2938_s8 + $0x3e0] sm:$0xff] }
 0x242   :  { %1793 = vmatmul.msk.f32.vlgmr.msra.gmra.mxu3 %vm681_vm3, %v2507_v47  ;;  %1794 = vmatmul.msk.f32.vlgmr.msrb.gmra.mxu2 %vm681_vm3, %v2507_v47 }
 0x243   :  { %1800 = vmatmul.msk.f32.vlgmr.msrb.gmra.mxu1 %vm681_vm3, %v2507_v47  ;;  %1049 = vmatpush.msra.mxu3 %v854_v37  ;;  %v836_v37 = vld [vmem:[%s2938_s8 + $0x290] sm:$0xff] }
 0x244   :  { %1069 = vmatpush.msrb.mxu2 %v855_v42  ;;  %1229 = vmatpush.msrb.mxu1 %v863_v50  ;;  %v838_v42 = vld [vmem:[%s2938_s8 + $0x2a0] sm:$0xff] }
 0x245   :  { %1050 = vmatpush.msra.mxu3 %v822_v51  ;;  %v846_v50 = vld [vmem:[%s2938_s8 + $0x2e0] sm:$0xff]  ;;  %v804_v51 = vld [vmem:[%s2938_s8 + $0x190] sm:$0xff] }
 0x246   :  { %1070 = vmatpush.msrb.mxu2 %v823_v29  ;;  %1230 = vmatpush.msrb.mxu1 %v831_v23  ;;  %v806_v29 = vld [vmem:[%s2938_s8 + $0x1a0] sm:$0xff] }
 0x247   :  { %1051 = vmatpush.msra.mxu3 %v790_v54  ;;  %v814_v23 = vld [vmem:[%s2938_s8 + $0x1e0] sm:$0xff]  ;;  %v772_v54 = vld [vmem:[%s2938_s8 + $0x90] sm:$0xff] }
 0x248   :  { %1071 = vmatpush.msrb.mxu2 %v791_v16  ;;  %1231 = vmatpush.msrb.mxu1 %v799_v58  ;;  %v774_v16 = vld [vmem:[%s2938_s8 + $0xa0] sm:$0xff]  ;;  %v871_v58 = vld [vmem:[%s2938_s8 + $0x3a8] sm:$0xff] }
 0x249   :  { %1052 = vmatpush.msra.mxu3 %v758_v25  ;;  %v782_v25 = vld [vmem:[%s2938_s8 + $0xe0] sm:$0xff] }
 0x24a   :  { %1795 = vmatmul.msk.f32.vlgmr.msrb.gmra.mxu3 %vm681_vm3, %v2507_v47  ;;  %1796 = vmatmul.msk.f32.vlgmr.msra.gmra.mxu2 %vm681_vm3, %v2507_v47 }
 0x24b   :  { %1803 = vmatmul.msk.f32.vlgmr.msra.gmra.mxu1 %vm681_vm3, %v2507_v47  ;;  %1072 = vmatpush.msrb.mxu2 %v759_v59  ;;  %v873_v59 = vld [vmem:[%s2938_s8 + $0x3b8] sm:$0xff] }
 0x24c   :  { %1232 = vmatpush.msrb.mxu1 %v767_v21  ;;  %1089 = vmatpush.msrb.mxu3 %v856_v62  ;;  %v881_v21 = vld [vmem:[%s2938_s8 + $0x3f8] sm:$0xff]  ;;  %v839_v62 = vld [vmem:[%s2938_s8 + $0x2a8] sm:$0xff] }
 0x24d   :  { %1129 = vmatpush.msra.mxu2 %v858_v10  ;;  %v841_v10 = vld [vmem:[%s2938_s8 + $0x2b8] sm:$0xff] }
 0x24e   :  { %1289 = vmatpush.msra.mxu1 %v866_v17  ;;  %1090 = vmatpush.msrb.mxu3 %v824_v0  ;;  %v849_v17 = vld [vmem:[%s2938_s8 + $0x2f8] sm:$0xff]  ;;  %v807_v0 = vld [vmem:[%s2938_s8 + $0x1a8] sm:$0xff] }
 0x24f   :  { %1130 = vmatpush.msra.mxu2 %v826_v3  ;;  %v809_v3 = vld [vmem:[%s2938_s8 + $0x1b8] sm:$0xff] }
 0x250   :  { %1290 = vmatpush.msra.mxu1 %v834_v5  ;;  %1091 = vmatpush.msrb.mxu3 %v792_v4  ;;  %v817_v5 = vld [vmem:[%s2938_s8 + $0x1f8] sm:$0xff]  ;;  %v775_v4 = vld [vmem:[%s2938_s8 + $0xa8] sm:$0xff] }
 0x251   :  { %1131 = vmatpush.msra.mxu2 %v794_v12  ;;  %v777_v12 = vld [vmem:[%s2938_s8 + $0xb8] sm:$0xff] }
 0x252   :  { %1291 = vmatpush.msra.mxu1 %v802_v63  ;;  %1797 = vmatmul.msk.f32.vlgmr.msra.gmra.mxu3 %vm681_vm3, %v2507_v47  ;;  %v874_v63 = vld [vmem:[%s2938_s8 + $0x3c0] sm:$0xff] }
 0x253   :  { %1798 = vmatmul.msk.f32.vlgmr.msrb.gmra.mxu2 %vm681_vm3, %v2507_v47  ;;  %1806 = vmatmul.msk.f32.vlgmr.msrb.gmra.mxu1 %vm681_vm3, %v2507_v47 }
 0x254   :  { %1092 = vmatpush.msrb.mxu3 %v760_v8  ;;  %1132 = vmatpush.msra.mxu2 %v762_v1  ;;  %v785_v8 = vld [vmem:[%s2938_s8 + $0xf8] sm:$0xff]  ;;  %v876_v1 = vld [vmem:[%s2938_s8 + $0x3d0] sm:$0xff] }
 0x255   :  { %1292 = vmatpush.msra.mxu1 %v770_v7  ;;  %v842_v7 = vld [vmem:[%s2938_s8 + $0x2c0] sm:$0xff] }
 0x256   :  { %1149 = vmatpush.msra.mxu3 %v859_v60  ;;  %1189 = vmatpush.msrb.mxu2 %v861_v2  ;;  %v844_v60 = vld [vmem:[%s2938_s8 + $0x2d0] sm:$0xff]  ;;  %v810_v2 = vld [vmem:[%s2938_s8 + $0x1c0] sm:$0xff] }
 0x257   :  { %1349 = vmatpush.msrb.mxu1 %v869_v11  ;;  %v812_v11 = vld [vmem:[%s2938_s8 + $0x1d0] sm:$0xff] }
 0x258   :  { %1150 = vmatpush.msra.mxu3 %v827_v61  ;;  %1190 = vmatpush.msrb.mxu2 %v829_v13  ;;  %v778_v61 = vld [vmem:[%s2938_s8 + $0xc0] sm:$0xff]  ;;  %v780_v13 = vld [vmem:[%s2938_s8 + $0xd0] sm:$0xff] }
 0x259   :  { %1350 = vmatpush.msrb.mxu1 %v837_v14  ;;  %v877_v14 = vld [vmem:[%s2938_s8 + $0x3d8] sm:$0xff] }
 0x25a   :  { %1151 = vmatpush.msra.mxu3 %v795_v15  ;;  %1191 = vmatpush.msrb.mxu2 %v797_v57  ;;  %v879_v15 = vld [vmem:[%s2938_s8 + $0x3e8] sm:$0xff]  ;;  %v845_v57 = vld [vmem:[%s2938_s8 + $0x2d8] sm:$0xff] }
 0x25b   :  { %1799 = vmatmul.msk.f32.vlgmr.msrb.gmra.mxu3 %vm681_vm3, %v2507_v47  ;;  %1801 = vmatmul.msk.f32.vlgmr.msra.gmra.mxu2 %vm681_vm3, %v2507_v47 }
 0x25c   :  { %1809 = vmatmul.msk.f32.vlgmr.msra.gmra.mxu1 %vm681_vm3, %v2507_v47  ;;  %1152 = vmatpush.msra.mxu3 %v763_v18  ;;  %v847_v18 = vld [vmem:[%s2938_s8 + $0x2e8] sm:$0xff] }
 0x25d   :  { %1351 = vmatpush.msrb.mxu1 %v805_v19  ;;  %1192 = vmatpush.msrb.mxu2 %v765_v53  ;;  %v813_v19 = vld [vmem:[%s2938_s8 + $0x1d8] sm:$0xff]  ;;  %v1846_v53 = vld [vmem:[%s2935_s5] ss:$0 sm:$0xff] }
 0x25e   :  { %1209 = vmatpush.msrb.mxu3 %v862_v20  ;;  %v815_v20 = vld [vmem:[%s2938_s8 + $0x1e8] sm:$0xff] }
 0x25f   :  { %1249 = vmatpush.msra.mxu2 %v864_v22  ;;  %1352 = vmatpush.msrb.mxu1 %v773_v49  ;;  %v781_v22 = vld [vmem:[%s2938_s8 + $0xd8] sm:$0xff]  ;;  %v880_v49 = vld [vmem:[%s2938_s8 + $0x3f0] sm:$0xff] }
 0x260   :  { %1210 = vmatpush.msrb.mxu3 %v830_v26  ;;  %v783_v26 = vld [vmem:[%s2938_s8 + $0xe8] sm:$0xff] }
 0x261   :  { %1409 = vmatpush.msra.mxu1 %v872_v24  ;;  %1250 = vmatpush.msra.mxu2 %v832_v28 }
 0x262   :  { %1211 = vmatpush.msrb.mxu3 %v798_v32  ;;  %v816_v32 = vld [vmem:[%s2938_s8 + $0x1f0] sm:$0xff] }
 0x263   :  { %1410 = vmatpush.msra.mxu1 %v840_v30  ;;  %1802 = vmatmul.msk.f32.vlgmr.msra.gmra.mxu3 %vm681_vm3, %v2507_v47  ;;  %v848_v30 = vld [vmem:[%s2938_s8 + $0x2f0] sm:$0xff] }
 0x264   :  { %1804 = vmatmul.msk.f32.vlgmr.msrb.gmra.mxu2 %vm681_vm3, %v2507_v47  ;;  %1812 = vmatmul.msk.f32.vlgmr.msrb.gmra.mxu1 %vm681_vm3, %v2507_v47 }
 0x265   :  { %1251 = vmatpush.msra.mxu2 %v800_v56  ;;  %1411 = vmatpush.msra.mxu1 %v808_v35  ;;  %v784_v56 = vld [vmem:[%s2938_s8 + $0xf0] sm:$0xff]  ;;  %v882_v35 = vld [vmem:[%s2939_s9] sm:$0xff] }
 0x266   :  { %1212 = vmatpush.msrb.mxu3 %v766_v36 }
 0x267   :  { %1252 = vmatpush.msra.mxu2 %v768_v9  ;;  %1412 = vmatpush.msra.mxu1 %v776_v48 }
 0x268   :  { %1269 = vmatpush.msra.mxu3 %v865_v38  ;;  %v891_v38 = vperm.slane %v882_v35, 1 }
 0x269   :  { %1309 = vmatpush.msrb.mxu2 %v867_v39  ;;  %1469 = vmatpush.msrb.mxu1 %v875_v34  ;;  %v892_v34 = vperm.slane %v882_v35, 2 }
 0x26a   :  { %1270 = vmatpush.msra.mxu3 %v833_v33  ;;  %v890_v33 = vperm.slane %v882_v35, 0 }
 0x26b   :  { %1310 = vmatpush.msrb.mxu2 %v835_v40  ;;  %1470 = vmatpush.msrb.mxu1 %v843_v52 }
 0x26c   :  { %1271 = vmatpush.msra.mxu3 %v801_v43  ;;  %1807 = vmatmul.msk.f32.vlgmr.msra.gmra.mxu2 %vm681_vm3, %v2507_v47 }
 0x26d   :  { %1805 = vmatmul.msk.f32.vlgmr.msrb.gmra.mxu3 %vm681_vm3, %v2507_v47  ;;  %1815 = vmatmul.msk.f32.vlgmr.msra.gmra.mxu1 %vm681_vm3, %v2507_v47 }
 0x26e   :  { %1311 = vmatpush.msrb.mxu2 %v803_v6  ;;  %1471 = vmatpush.msrb.mxu1 %v811_v55 }
 0x26f   :  { %1272 = vmatpush.msra.mxu3 %v769_v31 }
 0x270   :  { %1312 = vmatpush.msrb.mxu2 %v771_v41  ;;  %1472 = vmatpush.msrb.mxu1 %v779_v45 }
 0x271   :  { %1329 = vmatpush.msrb.mxu3 %v868_v44 }
 0x272   :  { %1369 = vmatpush.msra.mxu2 %v870_v46  ;;  %1529 = vmatpush.msra.mxu1 %v878_v27 }
 0x273   :  { %1330 = vmatpush.msrb.mxu3 %v836_v37 }
 0x274   :  { %1370 = vmatpush.msra.mxu2 %v838_v42  ;;  %1530 = vmatpush.msra.mxu1 %v846_v50 }
 0x275   :  { %1331 = vmatpush.msrb.mxu3 %v804_v51  ;;  %1810 = vmatmul.msk.f32.vlgmr.msrb.gmra.mxu2 %vm681_vm3, %v2507_v47  ;;  %v895_v51 = vperm.slane %v882_v35, 5 }
 0x276   :  { %1808 = vmatmul.msk.f32.vlgmr.msra.gmra.mxu3 %vm681_vm3, %v2507_v47  ;;  %1818 = vmatmul.msk.f32.vlgmr.msrb.gmra.mxu1 %vm681_vm3, %v2507_v47 }
 0x277   :  { %1371 = vmatpush.msra.mxu2 %v806_v29  ;;  %1531 = vmatpush.msra.mxu1 %v814_v23  ;;  %v897_v29 = vperm.slane %v882_v35, 7 }
 0x278   :  { %1332 = vmatpush.msrb.mxu3 %v772_v54  ;;  %v896_v54 = vperm.slane %v882_v35, 6 }
 0x279   :  { %1372 = vmatpush.msra.mxu2 %v774_v16  ;;  %1532 = vmatpush.msra.mxu1 %v782_v25  ;;  %v894_v25 = vperm.slane %v882_v35, 4 }
 0x27a   :  { %1389 = vmatpush.msra.mxu3 %v871_v58 }
 0x27b   :  { %1429 = vmatpush.msrb.mxu2 %v873_v59  ;;  %1589 = vmatpush.msrb.mxu1 %v881_v21  ;;  %v883_v59 = vld [vmem:[%s2939_s9 + $0x8] sm:$0xff] }
 0x27c   :  { %1390 = vmatpush.msra.mxu3 %v839_v62 }
 0x27d   :  { %1430 = vmatpush.msrb.mxu2 %v841_v10  ;;  %1590 = vmatpush.msrb.mxu1 %v849_v17 }
 0x27e   :  { %1391 = vmatpush.msra.mxu3 %v807_v0  ;;  %1813 = vmatmul.msk.f32.vlgmr.msra.gmra.mxu2 %vm681_vm3, %v2507_v47 }
 0x27f   :  { %1811 = vmatmul.msk.f32.vlgmr.msrb.gmra.mxu3 %vm681_vm3, %v2507_v47  ;;  %1821 = vmatmul.msk.f32.vlgmr.msra.gmra.mxu1 %vm681_vm3, %v2507_v47 }
 0x280   :  { %1431 = vmatpush.msrb.mxu2 %v809_v3  ;;  %1591 = vmatpush.msrb.mxu1 %v817_v5  ;;  %v900_v3 = vperm.slane %v883_v59, 2 }
 0x281   :  { %1392 = vmatpush.msra.mxu3 %v775_v4 }
 0x282   :  { %1432 = vmatpush.msrb.mxu2 %v777_v12  ;;  %1592 = vmatpush.msrb.mxu1 %v785_v8  ;;  %v899_v8 = vperm.slane %v883_v59, 1 }
 0x283   :  { %1449 = vmatpush.msrb.mxu3 %v874_v63 }
 0x284   :  { %1489 = vmatpush.msra.mxu2 %v876_v1  ;;  %v901_v1 = vperm.slane %v883_v59, 3 }
 0x285   :  { %1450 = vmatpush.msrb.mxu3 %v842_v7 }
 0x286   :  { %1490 = vmatpush.msra.mxu2 %v844_v60 }
 0x287   :  { %1451 = vmatpush.msrb.mxu3 %v810_v2  ;;  %1816 = vmatmul.msk.f32.vlgmr.msrb.gmra.mxu2 %vm681_vm3, %v2507_v47  ;;  %v898_v2 = vperm.slane %v883_v59, 0 }
 0x288   :  { %1814 = vmatmul.msk.f32.vlgmr.msra.gmra.mxu3 %vm681_vm3, %v2507_v47  ;;  %1824 = vmatmul.msk.f32.vlgmr.msrb.gmra.mxu1 %vm681_vm3, %v2507_v47 }
 0x289   :  { %1491 = vmatpush.msra.mxu2 %v812_v11  ;;  %1452 = vmatpush.msrb.mxu3 %v778_v61  ;;  %v702_v24 = vpop.f32.mrf.mxu2 }
 0x28a   :  { %v703_v28 = vadd.f32 %v1846_v53, %v702_v24 }
 0x28b   :  { %1492 = vmatpush.msra.mxu2 %v780_v13  ;;  %1509 = vmatpush.msra.mxu3 %v877_v14 }
 0x28c   :  { %705 = vst [vmem:[#allocation2] sm:$0x3] %v703_v28  ;;  %v903_v28 = vperm.slane %v883_v59, 5 }
 0x28d   :  { %1549 = vmatpush.msrb.mxu2 %v879_v15  ;;  %1510 = vmatpush.msra.mxu3 %v845_v57  ;;  %1705 = dma.vmem_to_hbm [thread:$0]  %s1701_s29, 32, %s1703_s6, [#allocation3]  }
 0x28f   :  { %1550 = vmatpush.msrb.mxu2 %v847_v18  ;;  %1511 = vmatpush.msra.mxu3 %v813_v19 }
 0x290   :  { %1817 = vmatmul.msk.f32.vlgmr.msrb.gmra.mxu3 %vm681_vm3, %v2507_v47  ;;  %1819 = vmatmul.msk.f32.vlgmr.msra.gmra.mxu2 %vm681_vm3, %v2507_v47 }
 0x291   :  { %1551 = vmatpush.msrb.mxu2 %v815_v20  ;;  %1512 = vmatpush.msra.mxu3 %v781_v22 }
 0x293   :  { %1569 = vmatpush.msrb.mxu3 %v880_v49  ;;  %1552 = vmatpush.msrb.mxu2 %v783_v26 }
 0x295   :  { %1570 = vmatpush.msrb.mxu3 %v848_v30 }
 0x297   :  { %1571 = vmatpush.msrb.mxu3 %v816_v32  ;;  %v904_v32 = vperm.slane %v883_v59, 6 }
 0x298   :  { %1820 = vmatmul.msk.f32.vlgmr.msra.gmra.mxu3 %vm681_vm3, %v2507_v47  ;;  %1822 = vmatmul.msk.f32.vlgmr.msrb.gmra.mxu2 %vm681_vm3, %v2507_v47 }
 0x299   :  { %1572 = vmatpush.msrb.mxu3 %v784_v56  ;;  %v902_v56 = vperm.slane %v883_v59, 4 }
 0x2a0   :  { %1823 = vmatmul.msk.f32.vlgmr.msrb.gmra.mxu3 %vm681_vm3, %v2507_v47  ;;  %v893_v47 = vperm.slane %v882_v35, 3  ;;  %v905_v35 = vperm.slane %v883_v59, 7 }
 0x2c0   :  { %v1114_v48 = vpop.f32.mrf.mxu1 }
 0x2c1   :  { %v1115_v16 = vadd.f32 %v1114_v48, %v897_v29 }
 0x2c3   :  { %v1634_v0 = vrot.slane %v1115_v16, 2 }
 0x2c5   :  { %v974_v36 = vpop.f32.mrf.mxu3  ;;  %v994_v9 = vpop.f32.mrf.mxu2 }
 0x2c6   :  { %v995_v39 = vadd.f32 %v994_v9, %v891_v38  ;;  %v975_v31 = vadd.f32 %v974_v36, %v890_v33  ;;  %v884_v38 = vld [vmem:[%s2939_s9 + $0x10] sm:$0xff] }
 0x2c7   :  { %v907_v33 = vperm.slane %v884_v38, 1  ;;  %v912_v16 = vperm.slane %v884_v38, 6 }
 0x2c8   :  { %v1629_v43 = vrot.slane %v995_v39, 6  ;;  %v1174_v46 = vpop.f32.mrf.mxu1 }
 0x2c9   :  { %v1175_v60 = vadd.f32 %v1174_v46, %v900_v3  ;;  %v910_v3 = vperm.slane %v884_v38, 4 }
 0x2ca   :  { %v1654_v45 = vsel %vm1653_vm8, %v975_v31, %v1629_v43 }
 0x2cb   :  { %v1636_v57 = vrot.slane %v1175_v60, 4 }
 0x2cd   :  { %v1014_v40 = vpop.f32.mrf.mxu3  ;;  %v1034_v52 = vpop.f32.mrf.mxu2 }
 0x2ce   :  { %v1015_v6 = vadd.f32 %v1014_v40, %v892_v34  ;;  %v1035_v55 = vadd.f32 %v1034_v52, %v893_v47  ;;  %v909_v52 = vperm.slane %v884_v38, 3 }
 0x2d0   :  { %v1630_v41 = vrot.slane %v1015_v6, 4  ;;  %v1631_v44 = vrot.slane %v1035_v55, 2  ;;  %v1234_v58 = vpop.f32.mrf.mxu1 }
 0x2d1   :  { %v1235_v36 = vadd.f32 %v1234_v58, %v903_v28 }
 0x2d2   :  { %v1656_v27 = vsel %vm1655_vm9, %v1630_v41, %v1631_v44 }
 0x2d3   :  { %v1657_v37 = vsel %vm305_vm0, %v1654_v45, %v1656_v27  ;;  %v1638_v40 = vrot.slane %v1235_v36, 6  ;;  %v908_v45 = vperm.slane %v884_v38, 2  ;;  %v906_v27 = vperm.slane %v884_v38, 0 }
 0x2d4   :  { %1687 = vst [vmem:[#allocation4] sm:$0xff] %v1657_v37 }
 0x2d5   :  { %v1054_v42 = vpop.f32.mrf.mxu3 }
 0x2d6   :  { %v1074_v50 = vpop.f32.mrf.mxu2  ;;  %v1055_v5 = vadd.f32 %v1054_v42, %v894_v25 }
 0x2d7   :  { %v1075_v23 = vadd.f32 %v1074_v50, %v895_v51 }
 0x2d9   :  { %v1632_v10 = vrot.slane %v1075_v23, 6  ;;  %v1294_v13 = vpop.f32.mrf.mxu1 }
 0x2da   :  { %v1295_v23 = vadd.f32 %v1294_v13, %v906_v27  ;;  %v885_v13 = vld [vmem:[%s2939_s9 + $0x18] sm:$0xff]  ;;  %s1905_s9 = smov [#allocation4]  }
 0x2db   :  { %v1658_v12 = vsel %vm1653_vm8, %v1055_v5, %v1632_v10  ;;  %s1711_s0 = sshll.u32 %s1905_s9, 4  ;;  %s1712_s0 = int_to_ptr.vmem [resolvable:$true] %s1711_s0 }
 0x2de   :  { %v1094_v21 = vpop.f32.mrf.mxu3  ;;  %v1134_v62 = vpop.f32.mrf.mxu2 }
 0x2df   :  { %v1095_v17 = vadd.f32 %v1094_v21, %v896_v54  ;;  %v1135_v18 = vadd.f32 %v1134_v62, %v898_v2  ;;  %v911_v21 = vperm.slane %v884_v38, 5  ;;  %v913_v62 = vperm.slane %v884_v38, 7 }
 0x2e1   :  { %v1633_v4 = vrot.slane %v1095_v17, 4  ;;  %v1354_v30 = vpop.f32.mrf.mxu1 }
 0x2e2   :  { %v1355_v37 = vadd.f32 %v1354_v30, %v909_v52  ;;  %v919_v30 = vperm.slane %v885_v13, 5 }
 0x2e3   :  { %v1659_v63 = vsel %vm1655_vm9, %v1633_v4, %v1634_v0 }
 0x2e4   :  { %v1660_v7 = vsel %vm305_vm0, %v1658_v12, %v1659_v63  ;;  %v1643_v54 = vrot.slane %v1355_v37, 2 }
 0x2e5   :  { %1688 = vst [vmem:[#allocation4 + $0x8] sm:$0xff] %v1660_v7 }
 0x2e6   :  { %v1154_v11 = vpop.f32.mrf.mxu3 }
 0x2e7   :  { %v1194_v61 = vpop.f32.mrf.mxu2  ;;  %v1155_v14 = vadd.f32 %v1154_v11, %v899_v8 }
 0x2e8   :  { %v1195_v15 = vadd.f32 %v1194_v61, %v901_v1 }
 0x2e9   :  { %v1635_v19 = vrot.slane %v1155_v14, 6 }
 0x2ea   :  { %v1637_v53 = vrot.slane %v1195_v15, 2  ;;  %v1414_v55 = vpop.f32.mrf.mxu1 }
 0x2eb   :  { %v1661_v20 = vsel %vm1653_vm8, %v1135_v18, %v1635_v19  ;;  %v1415_v17 = vadd.f32 %v1414_v55, %v912_v16  ;;  %v915_v18 = vperm.slane %v885_v13, 1  ;;  %v916_v19 = vperm.slane %v885_v13, 2 }
 0x2ec   :  { %v1662_v22 = vsel %vm1655_vm9, %v1636_v57, %v1637_v53  ;;  %v914_v53 = vperm.slane %v885_v13, 0 }
 0x2ed   :  { %v1663_v49 = vsel %vm305_vm0, %v1661_v20, %v1662_v22  ;;  %v1645_v8 = vrot.slane %v1415_v17, 4  ;;  %v917_v20 = vperm.slane %v885_v13, 3 }
 0x2ee   :  { %1689 = vst [vmem:[#allocation4 + $0x10] sm:$0xff] %v1663_v49 }
 0x2ef   :  { %v1254_v26 = vpop.f32.mrf.mxu2 }
 0x2f0   :  { %v1214_v24 = vpop.f32.mrf.mxu3  ;;  %v1255_v9 = vadd.f32 %v1254_v26, %v904_v32 }
 0x2f1   :  { %v1215_v34 = vadd.f32 %v1214_v24, %v902_v56 }
 0x2f2   :  { %v1639_v43 = vrot.slane %v1255_v9, 4 }
 0x2f3   :  { %v1664_v31 = vsel %vm1653_vm8, %v1215_v34, %v1638_v40  ;;  %v1474_v0 = vpop.f32.mrf.mxu1  ;;  %v918_v40 = vperm.slane %v885_v13, 4 }
 0x2f4   :  { %v1475_v22 = vadd.f32 %v1474_v0, %v915_v18 }
 0x2f6   :  { %v1647_v56 = vrot.slane %v1475_v22, 6 }
 0x2f8   :  { %v1314_v39 = vpop.f32.mrf.mxu2 }
 0x2f9   :  { %v1274_v48 = vpop.f32.mrf.mxu3  ;;  %v1315_v44 = vadd.f32 %v1314_v39, %v907_v33 }
 0x2fa   :  { %v1275_v47 = vadd.f32 %v1274_v48, %v905_v35  ;;  %v921_v35 = vperm.slane %v885_v13, 7 }
 0x2fb   :  { %v1641_v51 = vrot.slane %v1315_v44, 6 }
 0x2fc   :  { %v1640_v6 = vrot.slane %v1275_v47, 2  ;;  %v1534_v57 = vpop.f32.mrf.mxu1  ;;  %v920_v47 = vperm.slane %v885_v13, 6 }
 0x2fd   :  { %v1667_v25 = vsel %vm1653_vm8, %v1295_v23, %v1641_v51 }
 0x2fe   :  { %v1665_v41 = vsel %vm1655_vm9, %v1639_v43, %v1640_v6 }
 0x2ff   :  { %v1666_v46 = vsel %vm305_vm0, %v1664_v31, %v1665_v41  ;;  %v1535_v31 = vadd.f32 %v1534_v57, %v918_v40 }
 0x300   :  { %1690 = vst [vmem:[#allocation4 + $0x18] sm:$0xff] %v1666_v46 }
 0x301   :  { %v1374_v50 = vpop.f32.mrf.mxu2 }
 0x302   :  { %v1334_v42 = vpop.f32.mrf.mxu3  ;;  %v1375_v1 = vadd.f32 %v1374_v50, %v910_v3 }
 0x303   :  { %v1335_v29 = vadd.f32 %v1334_v42, %v908_v45 }
 0x305   :  { %v1642_v58 = vrot.slane %v1335_v29, 4  ;;  %v1594_v38 = vpop.f32.mrf.mxu1 }
 0x306   :  { %v1595_v52 = vadd.f32 %v1594_v38, %v921_v35 }
 0x307   :  { %v1668_v59 = vsel %vm1655_vm9, %v1642_v58, %v1643_v54 }
 0x308   :  { %v1669_v10 = vsel %vm305_vm0, %v1667_v25, %v1668_v59  ;;  %v1652_v41 = vrot.slane %v1595_v52, 2 }
 0x309   :  { %1691 = vst [vmem:[#allocation4 + $0x20] sm:$0xff] %v1669_v10 }
 0x30a   :  { %v1434_v4 = vpop.f32.mrf.mxu2 }
 0x30b   :  { %v1394_v5 = vpop.f32.mrf.mxu3  ;;  %v1435_v63 = vadd.f32 %v1434_v4, %v913_v62 }
 0x30c   :  { %v1395_v12 = vadd.f32 %v1394_v5, %v911_v21 }
 0x30d   :  { %v1646_v60 = vrot.slane %v1435_v63, 2 }
 0x30e   :  { %v1644_v7 = vrot.slane %v1395_v12, 6 }
 0x30f   :  { %v1671_v11 = vsel %vm1655_vm9, %v1645_v8, %v1646_v60 }
 0x310   :  { %v1670_v2 = vsel %vm1653_vm8, %v1375_v1, %v1644_v7 }
 0x311   :  { %v1672_v61 = vsel %vm305_vm0, %v1670_v2, %v1671_v11 }
 0x312   :  { %1692 = vst [vmem:[#allocation4 + $0x28] sm:$0xff] %v1672_v61 }
 0x313   :  { %v1454_v14 = vpop.f32.mrf.mxu3  ;;  %v1494_v15 = vpop.f32.mrf.mxu2 }
 0x314   :  { %v1495_v49 = vadd.f32 %v1494_v15, %v916_v19  ;;  %v1455_v26 = vadd.f32 %v1454_v14, %v914_v53 }
 0x316   :  { %v1648_v36 = vrot.slane %v1495_v49, 4  ;;  %v1673_v48 = vsel %vm1653_vm8, %v1455_v26, %v1647_v56 }
 0x31b   :  { %v1514_v24 = vpop.f32.mrf.mxu3  ;;  %v1554_v32 = vpop.f32.mrf.mxu2 }
 0x31c   :  { %v1515_v28 = vadd.f32 %v1514_v24, %v917_v20  ;;  %v1555_v34 = vadd.f32 %v1554_v32, %v919_v30 }
 0x31e   :  { %v1649_v9 = vrot.slane %v1515_v28, 2  ;;  %v1650_v6 = vrot.slane %v1555_v34, 6 }
 0x320   :  { %v1674_v39 = vsel %vm1655_vm9, %v1648_v36, %v1649_v9  ;;  %v1676_v45 = vsel %vm1653_vm8, %v1535_v31, %v1650_v6 }
 0x321   :  { %v1675_v33 = vsel %vm305_vm0, %v1673_v48, %v1674_v39 }
 0x322   :  { %1693 = vst [vmem:[#allocation4 + $0x30] sm:$0xff] %v1675_v33 }
 0x323   :  { %v1574_v43 = vpop.f32.mrf.mxu3 }
 0x324   :  { %v1575_v55 = vadd.f32 %v1574_v43, %v920_v47 }
 0x326   :  { %v1651_v44 = vrot.slane %v1575_v55, 4 }
 0x328   :  { %v1677_v46 = vsel %vm1655_vm9, %v1651_v44, %v1652_v41 }
 0x329   :  { %v1678_v27 = vsel %vm305_vm0, %v1676_v45, %v1677_v46 }
 0x32a   :  { %1694 = vst [vmem:[#allocation4 + $0x38] sm:$0xff] %v1678_v27 }
 0x32b   :  { %1716 = dma.vmem_to_hbm [thread:$0]  %s1712_s0, 1024, %s1714_s17, [#allocation5]  }
 0x32c   :  { %1899 = dma.done.wait [#allocation3], 32  }
 0x32d   :  { %1900 = vsyncadd [#allocation3], 4294967264 }
 0x32e   :  { %1901 = dma.done.wait [#allocation5], 1024  }
 0x32f   :  { %1902 = vsyncadd [#allocation5], 4294966272 }
 0x330   :  { %1725 = vsyncpa [#allocation3], 1 }
 0x331   :  { %1726 = vsyncpa [#allocation5], 1 }

</bundles_post_ra>
